<compile_context>
chip_gen: v7x
topology: tpu7x:2x2x1
jax: 0.10.0
libtpu: 0.0.40
codegen_flags: <defaults>
</compile_context>

<pallas_src>
import jax
import jax.numpy as jnp
from jax.experimental import pallas as pl
from jax.experimental.pallas import tpu as pltpu

NUM_BLOCKS = 4
DILATIONS = [2 ** i for i in range(NUM_BLOCKS)]

# ---- bias slab row layout (one bias vector per row, at lane offset 0) ----
_B_INIT = 0
_B_C1 = 1                         # rows 1..4  : conv1 bias per block
_B_C2 = _B_C1 + NUM_BLOCKS        # rows 5..8  : conv2 bias per block
_B_RES = _B_C2 + NUM_BLOCKS       # rows 9..12 : res   bias per block
_B_F1 = _B_RES + NUM_BLOCKS       # 13
_B_F2 = _B_F1 + 1                 # 14
_B_FC1 = _B_F2 + 1                # 15
_B_FC2 = _B_FC1 + 1               # 16
_B_ROWS = ((_B_FC2 + 1 + 7) // 8) * 8

# ---- head weight slab row layout (256 lanes wide, weights at lane offset 0) ----
_H_F1A, _H_F1B = 0, 32            # final_conv1 taps: (32, 128) each
_H_F2A, _H_F2B = 64, 192          # final_conv2 taps: (128, 256) each
_H_FC1 = 320                      # fc1: (256, 128)
_H_FC2 = 576                      # fc2: (128, out)
_H_ROWS = 704


# ----------------------------------------------------------------------------
# Fused kernel: whole forward pass for one batch element per grid step.
# ----------------------------------------------------------------------------
def _wavenet_kernel(xf_ref, initw_ref, blk3_ref, c2w_ref, headw_ref, bias_ref,
                    out_ref, h_ref, pad_ref):
    lm = xf_ref.shape[1]                       # activation length after the initial conv

    def dot32(a, b):
        return jnp.dot(a, b, preferred_element_type=jnp.float32)

    # ---- initial conv (k=2, padding=1): taps pre-fused host-side -> one matmul ----
    h0 = dot32(xf_ref[0], initw_ref[...]) + bias_ref[_B_INIT:_B_INIT + 1, 0:32]
    h_ref[0:lm, :] = jnp.maximum(h0, 0.0)

    # ---- dilated residual blocks ----
    for blk in range(NUM_BLOCKS):
        d = DILATIONS[blk]

        # conv1: padding 0 (the `^` quirk), length lm -> lm - d; two tap matmuls.
        u = (dot32(h_ref[0:lm - d, :], blk3_ref[blk, 0])
             + dot32(h_ref[d:lm, :], blk3_ref[blk, 1])
             + bias_ref[_B_C1 + blk:_B_C1 + blk + 1, 0:32])
        u = jnp.maximum(u, 0.0)

        # conv2: padding == dilation, fused into ONE K=64 matmul.
        #   pad_ref lanes  0:32 = tap0: zeros rows [0, d),      u at rows [d, lm)
        #   pad_ref lanes 32:64 = tap1: u at rows [0, lm - d),  zeros rows [lm - d, lm)
        # Only margin rows are zeroed; must be re-zeroed every block (earlier blocks
        # with smaller d leave stale data there).  Zero first, then store u.
        pad_ref[0:d, :] = jnp.zeros((d, 64), jnp.float32)
        pad_ref[lm - d:lm, :] = jnp.zeros((d, 64), jnp.float32)
        pad_ref[d:lm, 0:32] = u
        pad_ref[0:lm - d, 32:64] = u
        v = dot32(pad_ref[0:lm, :], c2w_ref[blk]) \
            + bias_ref[_B_C2 + blk:_B_C2 + blk + 1, 0:32]
        v = jnp.maximum(v, 0.0)

        # 1x1 residual conv on the block input (no ReLU), added after conv2's ReLU.
        res = dot32(h_ref[0:lm, :], blk3_ref[blk, 2]) \
            + bias_ref[_B_RES + blk:_B_RES + blk + 1, 0:32]
        h_ref[0:lm, :] = v + res

    # ---- final convs + fc head: only the receptive field of x[:, :, -1] ----
    y1 = (dot32(h_ref[lm - 3:lm - 1, :], headw_ref[_H_F1A:_H_F1A + 32, 0:128])
          + dot32(h_ref[lm - 2:lm, :], headw_ref[_H_F1B:_H_F1B + 32, 0:128])
          + bias_ref[_B_F1:_B_F1 + 1, 0:128])
    y1 = jnp.maximum(y1, 0.0)                                          # (2, 128)
    y2 = (dot32(y1[0:1, :], headw_ref[_H_F2A:_H_F2A + 128, 0:256])
          + dot32(y1[1:2, :], headw_ref[_H_F2B:_H_F2B + 128, 0:256])
          + bias_ref[_B_F2:_B_F2 + 1, 0:256])
    y2 = jnp.maximum(y2, 0.0)                                          # (1, 256)
    y3 = jnp.maximum(
        dot32(y2, headw_ref[_H_FC1:_H_FC1 + 256, 0:128])
        + bias_ref[_B_FC1:_B_FC1 + 1, 0:128], 0.0)                     # (1, 128)
    nout = out_ref.shape[-1]
    y4 = dot32(y3, headw_ref[_H_FC2:_H_FC2 + 128, 0:nout]) \
        + bias_ref[_B_FC2:_B_FC2 + 1, 0:nout]                          # (1, out)
    out_ref[0] = y4.astype(out_ref.dtype)


# ----------------------------------------------------------------------------
# Host-side weight packing (done once, outside the kernel).
# ----------------------------------------------------------------------------
def _fold_k2(w):
    """Conv1d weight (Cout, Cin, 2) -> (2*Cin, Cout): rows [0:Cin]=tap0.T, [Cin:2Cin]=tap1.T."""
    return jnp.concatenate([w[:, :, 0].T, w[:, :, 1].T], axis=0).astype(jnp.float32)


def _pack_params(params, out_channels):
    f32 = jnp.float32
    init_w = _fold_k2(params["init_w"])                                    # (2*Cin, 32)

    blk3 = jnp.stack([
        jnp.stack([p["conv1_w"][:, :, 0].T,
                   p["conv1_w"][:, :, 1].T,
                   p["res_w"][:, :, 0].T], axis=0)
        for p in params["blocks"]], axis=0).astype(f32)                    # (NB, 3, 32, 32)

    c2w = jnp.stack([_fold_k2(p["conv2_w"]) for p in params["blocks"]],
                    axis=0).astype(f32)                                    # (NB, 64, 32)

    head = jnp.zeros((_H_ROWS, 256), f32)
    f1 = params["final1_w"].astype(f32)
    f2 = params["final2_w"].astype(f32)
    head = head.at[_H_F1A:_H_F1A + 32, 0:128].set(f1[:, :, 0].T)
    head = head.at[_H_F1B:_H_F1B + 32, 0:128].set(f1[:, :, 1].T)
    head = head.at[_H_F2A:_H_F2A + 128, 0:256].set(f2[:, :, 0].T)
    head = head.at[_H_F2B:_H_F2B + 128, 0:256].set(f2[:, :, 1].T)
    head = head.at[_H_FC1:_H_FC1 + 256, 0:128].set(params["fc1_w"].T.astype(f32))
    head = head.at[_H_FC2:_H_FC2 + 128, 0:out_channels].set(params["fc2_w"].T.astype(f32))

    bias = jnp.zeros((_B_ROWS, 256), f32)
    bias = bias.at[_B_INIT, 0:32].set(params["init_b"].astype(f32))
    for i, p in enumerate(params["blocks"]):
        bias = bias.at[_B_C1 + i, 0:32].set(p["conv1_b"].astype(f32))
        bias = bias.at[_B_C2 + i, 0:32].set(p["conv2_b"].astype(f32))
        bias = bias.at[_B_RES + i, 0:32].set(p["res_b"].astype(f32))
    bias = bias.at[_B_F1, 0:128].set(params["final1_b"].astype(f32))
    bias = bias.at[_B_F2, 0:256].set(params["final2_b"].astype(f32))
    bias = bias.at[_B_FC1, 0:128].set(params["fc1_b"].astype(f32))
    bias = bias.at[_B_FC2, 0:out_channels].set(params["fc2_b"].astype(f32))
    return init_w, blk3, c2w, head, bias


def wavenet_forward(x_bcl, params):
    """x_bcl: (B, C_in, L) exactly like the PyTorch module; returns (B, out_channels)."""
    B, c_in, L = x_bcl.shape
    lm = L + 1                       # length after the initial conv (k=2, padding=1)
    assert lm - max(DILATIONS) >= 1 and lm >= 3, "sequence too short for the dilation stack"

    # Channels-last, the initial conv's zero padding, and its two taps fused host-side.
    x = jnp.transpose(x_bcl, (0, 2, 1)).astype(jnp.float32)                # (B, L, Cin)
    xpad = jnp.pad(x, ((0, 0), (1, 1), (0, 0)))                            # (B, L+2, Cin)
    xf = jnp.concatenate([xpad[:, 0:lm, :], xpad[:, 1:lm + 1, :]], axis=-1)  # (B, lm, 2*Cin)

    out_channels = params["fc2_b"].shape[0]
    init_w, blk3, c2w, head, bias = _pack_params(params, out_channels)

    rows = ((lm + 7) // 8) * 8

    def const_spec(a):
        n = a.ndim
        return pl.BlockSpec(a.shape, lambda b, _n=n: (0,) * _n)

    out = pl.pallas_call(
        _wavenet_kernel,
        grid=(B,),
        out_shape=jax.ShapeDtypeStruct((B, 1, out_channels), jnp.float32),
        in_specs=[pl.BlockSpec((1, lm, 2 * c_in), lambda b: (b, 0, 0)),
                  const_spec(init_w), const_spec(blk3), const_spec(c2w),
                  const_spec(head), const_spec(bias)],
        out_specs=pl.BlockSpec((1, 1, out_channels), lambda b: (b, 0, 0)),
        scratch_shapes=[pltpu.VMEM((rows, 32), jnp.float32),    # resident block activation h
                        pltpu.VMEM((rows, 64), jnp.float32)],   # fused conv2 pad workspace
        compiler_params=pltpu.CompilerParams(
            dimension_semantics=("parallel",)),
    )(xf, init_w, blk3, c2w, head, bias)
    return out.reshape(B, out_channels)


# ----------------------------------------------------------------------------
# Pure-JAX reference (mirrors the PyTorch module op-for-op, full-length finals).
# ----------------------------------------------------------------------------
def _conv1d_ref(x_blc, w, b, dilation, padding):
    if padding > 0:
        x_blc = jnp.pad(x_blc, ((0, 0), (padding, padding), (0, 0)))
    lout = x_blc.shape[1] - dilation
    return (jnp.einsum("blc,oc->blo", x_blc[:, 0:lout, :], w[:, :, 0])
            + jnp.einsum("blc,oc->blo", x_blc[:, dilation:dilation + lout, :], w[:, :, 1])
            + b)


def wavenet_forward_ref(x_bcl, params):
    x = jnp.transpose(x_bcl, (0, 2, 1)).astype(jnp.float32)
    x = jax.nn.relu(_conv1d_ref(x, params["init_w"], params["init_b"], 1, 1))
    for p, d in zip(params["blocks"], DILATIONS):
        out = jax.nn.relu(_conv1d_ref(x, p["conv1_w"], p["conv1_b"], d, 0))
        out = jax.nn.relu(_conv1d_ref(out, p["conv2_w"], p["conv2_b"], d, d))
        res = jnp.einsum("blc,oc->blo", x, p["res_w"][:, :, 0]) + p["res_b"]
        x = out + res
    x = jax.nn.relu(_conv1d_ref(x, params["final1_w"], params["final1_b"], 1, 0))
    x = jax.nn.relu(_conv1d_ref(x, params["final2_w"], params["final2_b"], 1, 0))
    x = x[:, -1, :]
    x = jax.nn.relu(x @ params["fc1_w"].T + params["fc1_b"])
    return x @ params["fc2_w"].T + params["fc2_b"]


# ----------------------------------------------------------------------------
# Deterministic parameter init (shapes follow the nn.Module __init__)
# ----------------------------------------------------------------------------
def init_params(key, in_channels, out_channels):
    keys = iter(jax.random.split(key, 128))

    def conv_p(cin, cout, k):
        w = 0.1 * jax.random.normal(next(keys), (cout, cin, k), jnp.float32)
        b = 0.1 * jax.random.normal(next(keys), (cout,), jnp.float32)
        return w, b

    def lin_p(cin, cout):
        w = 0.1 * jax.random.normal(next(keys), (cout, cin), jnp.float32)
        b = 0.1 * jax.random.normal(next(keys), (cout,), jnp.float32)
        return w, b

    params = {}
    params["init_w"], params["init_b"] = conv_p(in_channels, 32, 2)
    params["blocks"] = []
    for _ in DILATIONS:
        c1w, c1b = conv_p(32, 32, 2)
        c2w, c2b = conv_p(32, 32, 2)
        rw, rb = conv_p(32, 32, 1)
        params["blocks"].append(dict(conv1_w=c1w, conv1_b=c1b,
                                     conv2_w=c2w, conv2_b=c2b,
                                     res_w=rw, res_b=rb))
    params["final1_w"], params["final1_b"] = conv_p(32, 128, 2)
    params["final2_w"], params["final2_b"] = conv_p(128, 256, 2)
    params["fc1_w"], params["fc1_b"] = lin_p(256, 128)
    params["fc2_w"], params["fc2_b"] = lin_p(128, out_channels)
    return params


if __name__ == "__main__":
    B, C_IN, L, C_OUT = 2, 4, 16, 6
    key = jax.random.PRNGKey(0)
    kx, kp = jax.random.split(key)
    x = jax.random.normal(kx, (B, C_IN, L), jnp.float32)
    params = init_params(kp, C_IN, C_OUT)

    y = jax.block_until_ready(jax.jit(wavenet_forward)(x, params))
    y_ref = jax.block_until_ready(wavenet_forward_ref(x, params))

    assert y.shape == (B, C_OUT), y.shape
    assert bool(jnp.all(jnp.isfinite(y)))
    assert bool(jnp.allclose(y, y_ref, rtol=5e-3, atol=5e-3)), (y, y_ref)
    print("KERNEL_OK")
</pallas_src>

<mosaic_0001>
module attributes {stable_mosaic.version = 11 : i64} {
  func.func @_wavenet_kernel(%arg0: i32, %arg1: memref<1x17x8xf32, #tpu.memory_space<vmem>>, %arg2: memref<8x32xf32, #tpu.memory_space<vmem>>, %arg3: memref<4x3x32x32xf32, #tpu.memory_space<vmem>>, %arg4: memref<4x64x32xf32, #tpu.memory_space<vmem>>, %arg5: memref<704x256xf32, #tpu.memory_space<vmem>>, %arg6: memref<24x256xf32, #tpu.memory_space<vmem>>, %arg7: memref<1x1x6xf32, #tpu.memory_space<vmem>>, %arg8: memref<24x32xf32, #tpu.memory_space<vmem>>, %arg9: memref<24x64xf32, #tpu.memory_space<vmem>>) attributes {dimension_semantics = [#tpu.dimension_semantics<parallel>], iteration_bounds = array<i64: 2>, scalar_prefetch = 0 : i64, scratch_operands = 2 : i64, tpu.core_type = #tpu.core_type<tc>, window_params = [{transform_indices = @transform_0, window_bounds = array<i64: 1, 17, 8>}, {pipeline_mode = #tpu.pipeline_mode<synchronous>, transform_indices = @transform_1, window_bounds = array<i64: 8, 32>}, {pipeline_mode = #tpu.pipeline_mode<synchronous>, transform_indices = @transform_2, window_bounds = array<i64: 4, 3, 32, 32>}, {pipeline_mode = #tpu.pipeline_mode<synchronous>, transform_indices = @transform_3, window_bounds = array<i64: 4, 64, 32>}, {pipeline_mode = #tpu.pipeline_mode<synchronous>, transform_indices = @transform_4, window_bounds = array<i64: 704, 256>}, {pipeline_mode = #tpu.pipeline_mode<synchronous>, transform_indices = @transform_5, window_bounds = array<i64: 24, 256>}, {transform_indices = @transform_6, window_bounds = array<i64: 1, 1, 6>}]} {
    %c0 = arith.constant 0 : index
    %c0_0 = arith.constant 0 : index
    %c0_1 = arith.constant 0 : index
    %0 = vector.load %arg1[%c0, %c0_0, %c0_1] : memref<1x17x8xf32, #tpu.memory_space<vmem>>, vector<1x17x8xf32>
    %1 = vector.shape_cast %0 : vector<1x17x8xf32> to vector<17x8xf32>
    %c0_2 = arith.constant 0 : index
    %c0_3 = arith.constant 0 : index
    %2 = vector.load %arg2[%c0_2, %c0_3] : memref<8x32xf32, #tpu.memory_space<vmem>>, vector<8x32xf32>
    %cst = arith.constant dense<0.000000e+00> : vector<17x32xf32>
    %3 = tpu.matmul %1, %2, %cst {dimension_numbers = #tpu.dot_dimension_numbers<[1], [0], [0], [1], [0, 0, 1, 1], [], []>} : vector<17x8xf32>, vector<8x32xf32>, vector<17x32xf32> -> vector<17x32xf32>
    %c0_4 = arith.constant 0 : index
    %c0_5 = arith.constant 0 : index
    %4 = vector.load %arg6[%c0_4, %c0_5] : memref<24x256xf32, #tpu.memory_space<vmem>>, vector<1x32xf32>
    %5 = vector.broadcast %4 : vector<1x32xf32> to vector<17x32xf32>
    %6 = arith.addf %3, %5 : vector<17x32xf32>
    %cst_6 = arith.constant 0.000000e+00 : f32
    %7 = vector.broadcast %cst_6 : f32 to vector<17x32xf32>
    %8 = arith.maximumf %6, %7 : vector<17x32xf32>
    %c0_7 = arith.constant 0 : index
    %c0_8 = arith.constant 0 : index
    %9 = vector.load %arg8[%c0_7, %c0_8] : memref<24x32xf32, #tpu.memory_space<vmem>>, vector<17x32xf32>
    tpu.vector_store %arg8[%c0_7, %c0_8], %8 {strides = array<i32>} : memref<24x32xf32, #tpu.memory_space<vmem>>, vector<17x32xf32>,
    %c0_9 = arith.constant 0 : index
    %c0_10 = arith.constant 0 : index
    %10 = vector.load %arg8[%c0_9, %c0_10] : memref<24x32xf32, #tpu.memory_space<vmem>>, vector<16x32xf32>
    %c0_11 = arith.constant 0 : index
    %c0_12 = arith.constant 0 : index
    %c0_13 = arith.constant 0 : index
    %c0_14 = arith.constant 0 : index
    %11 = vector.load %arg3[%c0_11, %c0_12, %c0_13, %c0_14] : memref<4x3x32x32xf32, #tpu.memory_space<vmem>>, vector<1x1x32x32xf32>
    %12 = vector.shape_cast %11 : vector<1x1x32x32xf32> to vector<32x32xf32>
    %cst_15 = arith.constant dense<0.000000e+00> : vector<16x32xf32>
    %13 = tpu.matmul %10, %12, %cst_15 {dimension_numbers = #tpu.dot_dimension_numbers<[1], [0], [0], [1], [0, 0, 1, 1], [], []>} : vector<16x32xf32>, vector<32x32xf32>, vector<16x32xf32> -> vector<16x32xf32>
    %c1 = arith.constant 1 : index
    %c0_16 = arith.constant 0 : index
    %14 = vector.load %arg8[%c1, %c0_16] : memref<24x32xf32, #tpu.memory_space<vmem>>, vector<16x32xf32>
    %c0_17 = arith.constant 0 : index
    %c1_18 = arith.constant 1 : index
    %c0_19 = arith.constant 0 : index
    %c0_20 = arith.constant 0 : index
    %15 = vector.load %arg3[%c0_17, %c1_18, %c0_19, %c0_20] : memref<4x3x32x32xf32, #tpu.memory_space<vmem>>, vector<1x1x32x32xf32>
    %16 = vector.shape_cast %15 : vector<1x1x32x32xf32> to vector<32x32xf32>
    %cst_21 = arith.constant dense<0.000000e+00> : vector<16x32xf32>
    %17 = tpu.matmul %14, %16, %cst_21 {dimension_numbers = #tpu.dot_dimension_numbers<[1], [0], [0], [1], [0, 0, 1, 1], [], []>} : vector<16x32xf32>, vector<32x32xf32>, vector<16x32xf32> -> vector<16x32xf32>
    %18 = arith.addf %13, %17 : vector<16x32xf32>
    %c1_22 = arith.constant 1 : index
    %c0_23 = arith.constant 0 : index
    %19 = vector.load %arg6[%c1_22, %c0_23] : memref<24x256xf32, #tpu.memory_space<vmem>>, vector<1x32xf32>
    %20 = vector.broadcast %19 : vector<1x32xf32> to vector<16x32xf32>
    %21 = arith.addf %18, %20 : vector<16x32xf32>
    %cst_24 = arith.constant 0.000000e+00 : f32
    %22 = vector.broadcast %cst_24 : f32 to vector<16x32xf32>
    %23 = arith.maximumf %21, %22 : vector<16x32xf32>
    %cst_25 = arith.constant 0.000000e+00 : f32
    %24 = vector.broadcast %cst_25 : f32 to vector<1x64xf32>
    %c0_26 = arith.constant 0 : index
    %c0_27 = arith.constant 0 : index
    %25 = vector.load %arg9[%c0_26, %c0_27] : memref<24x64xf32, #tpu.memory_space<vmem>>, vector<1x64xf32>
    tpu.vector_store %arg9[%c0_26, %c0_27], %24 {strides = array<i32>} : memref<24x64xf32, #tpu.memory_space<vmem>>, vector<1x64xf32>,
    %cst_28 = arith.constant 0.000000e+00 : f32
    %26 = vector.broadcast %cst_28 : f32 to vector<1x64xf32>
    %c16 = arith.constant 16 : index
    %c0_29 = arith.constant 0 : index
    %27 = vector.load %arg9[%c16, %c0_29] : memref<24x64xf32, #tpu.memory_space<vmem>>, vector<1x64xf32>
    tpu.vector_store %arg9[%c16, %c0_29], %26 {strides = array<i32>} : memref<24x64xf32, #tpu.memory_space<vmem>>, vector<1x64xf32>,
    %c1_30 = arith.constant 1 : index
    %c0_31 = arith.constant 0 : index
    %28 = vector.load %arg9[%c1_30, %c0_31] : memref<24x64xf32, #tpu.memory_space<vmem>>, vector<16x32xf32>
    tpu.vector_store %arg9[%c1_30, %c0_31], %23 {strides = array<i32>} : memref<24x64xf32, #tpu.memory_space<vmem>>, vector<16x32xf32>,
    %c0_32 = arith.constant 0 : index
    %c32 = arith.constant 32 : index
    %29 = vector.load %arg9[%c0_32, %c32] : memref<24x64xf32, #tpu.memory_space<vmem>>, vector<16x32xf32>
    tpu.vector_store %arg9[%c0_32, %c32], %23 {strides = array<i32>} : memref<24x64xf32, #tpu.memory_space<vmem>>, vector<16x32xf32>,
    %c0_33 = arith.constant 0 : index
    %c0_34 = arith.constant 0 : index
    %30 = vector.load %arg9[%c0_33, %c0_34] : memref<24x64xf32, #tpu.memory_space<vmem>>, vector<17x64xf32>
    %c0_35 = arith.constant 0 : index
    %c0_36 = arith.constant 0 : index
    %c0_37 = arith.constant 0 : index
    %31 = vector.load %arg4[%c0_35, %c0_36, %c0_37] : memref<4x64x32xf32, #tpu.memory_space<vmem>>, vector<1x64x32xf32>
    %32 = vector.shape_cast %31 : vector<1x64x32xf32> to vector<64x32xf32>
    %cst_38 = arith.constant dense<0.000000e+00> : vector<17x32xf32>
    %33 = tpu.matmul %30, %32, %cst_38 {dimension_numbers = #tpu.dot_dimension_numbers<[1], [0], [0], [1], [0, 0, 1, 1], [], []>} : vector<17x64xf32>, vector<64x32xf32>, vector<17x32xf32> -> vector<17x32xf32>
    %c5 = arith.constant 5 : index
    %c0_39 = arith.constant 0 : index
    %34 = vector.load %arg6[%c5, %c0_39] : memref<24x256xf32, #tpu.memory_space<vmem>>, vector<1x32xf32>
    %35 = vector.broadcast %34 : vector<1x32xf32> to vector<17x32xf32>
    %36 = arith.addf %33, %35 : vector<17x32xf32>
    %cst_40 = arith.constant 0.000000e+00 : f32
    %37 = vector.broadcast %cst_40 : f32 to vector<17x32xf32>
    %38 = arith.maximumf %36, %37 : vector<17x32xf32>
    %c0_41 = arith.constant 0 : index
    %c0_42 = arith.constant 0 : index
    %39 = vector.load %arg8[%c0_41, %c0_42] : memref<24x32xf32, #tpu.memory_space<vmem>>, vector<17x32xf32>
    %c0_43 = arith.constant 0 : index
    %c2 = arith.constant 2 : index
    %c0_44 = arith.constant 0 : index
    %c0_45 = arith.constant 0 : index
    %40 = vector.load %arg3[%c0_43, %c2, %c0_44, %c0_45] : memref<4x3x32x32xf32, #tpu.memory_space<vmem>>, vector<1x1x32x32xf32>
    %41 = vector.shape_cast %40 : vector<1x1x32x32xf32> to vector<32x32xf32>
    %cst_46 = arith.constant dense<0.000000e+00> : vector<17x32xf32>
    %42 = tpu.matmul %39, %41, %cst_46 {dimension_numbers = #tpu.dot_dimension_numbers<[1], [0], [0], [1], [0, 0, 1, 1], [], []>} : vector<17x32xf32>, vector<32x32xf32>, vector<17x32xf32> -> vector<17x32xf32>
    %c9 = arith.constant 9 : index
    %c0_47 = arith.constant 0 : index
    %43 = vector.load %arg6[%c9, %c0_47] : memref<24x256xf32, #tpu.memory_space<vmem>>, vector<1x32xf32>
    %44 = vector.broadcast %43 : vector<1x32xf32> to vector<17x32xf32>
    %45 = arith.addf %42, %44 : vector<17x32xf32>
    %46 = arith.addf %38, %45 : vector<17x32xf32>
    %c0_48 = arith.constant 0 : index
    %c0_49 = arith.constant 0 : index
    %47 = vector.load %arg8[%c0_48, %c0_49] : memref<24x32xf32, #tpu.memory_space<vmem>>, vector<17x32xf32>
    tpu.vector_store %arg8[%c0_48, %c0_49], %46 {strides = array<i32>} : memref<24x32xf32, #tpu.memory_space<vmem>>, vector<17x32xf32>,
    %c0_50 = arith.constant 0 : index
    %c0_51 = arith.constant 0 : index
    %48 = vector.load %arg8[%c0_50, %c0_51] : memref<24x32xf32, #tpu.memory_space<vmem>>, vector<15x32xf32>
    %c1_52 = arith.constant 1 : index
    %c0_53 = arith.constant 0 : index
    %c0_54 = arith.constant 0 : index
    %c0_55 = arith.constant 0 : index
    %49 = vector.load %arg3[%c1_52, %c0_53, %c0_54, %c0_55] : memref<4x3x32x32xf32, #tpu.memory_space<vmem>>, vector<1x1x32x32xf32>
    %50 = vector.shape_cast %49 : vector<1x1x32x32xf32> to vector<32x32xf32>
    %cst_56 = arith.constant dense<0.000000e+00> : vector<15x32xf32>
    %51 = tpu.matmul %48, %50, %cst_56 {dimension_numbers = #tpu.dot_dimension_numbers<[1], [0], [0], [1], [0, 0, 1, 1], [], []>} : vector<15x32xf32>, vector<32x32xf32>, vector<15x32xf32> -> vector<15x32xf32>
    %c2_57 = arith.constant 2 : index
    %c0_58 = arith.constant 0 : index
    %52 = vector.load %arg8[%c2_57, %c0_58] : memref<24x32xf32, #tpu.memory_space<vmem>>, vector<15x32xf32>
    %c1_59 = arith.constant 1 : index
    %c1_60 = arith.constant 1 : index
    %c0_61 = arith.constant 0 : index
    %c0_62 = arith.constant 0 : index
    %53 = vector.load %arg3[%c1_59, %c1_60, %c0_61, %c0_62] : memref<4x3x32x32xf32, #tpu.memory_space<vmem>>, vector<1x1x32x32xf32>
    %54 = vector.shape_cast %53 : vector<1x1x32x32xf32> to vector<32x32xf32>
    %cst_63 = arith.constant dense<0.000000e+00> : vector<15x32xf32>
    %55 = tpu.matmul %52, %54, %cst_63 {dimension_numbers = #tpu.dot_dimension_numbers<[1], [0], [0], [1], [0, 0, 1, 1], [], []>} : vector<15x32xf32>, vector<32x32xf32>, vector<15x32xf32> -> vector<15x32xf32>
    %56 = arith.addf %51, %55 : vector<15x32xf32>
    %c2_64 = arith.constant 2 : index
    %c0_65 = arith.constant 0 : index
    %57 = vector.load %arg6[%c2_64, %c0_65] : memref<24x256xf32, #tpu.memory_space<vmem>>, vector<1x32xf32>
    %58 = vector.broadcast %57 : vector<1x32xf32> to vector<15x32xf32>
    %59 = arith.addf %56, %58 : vector<15x32xf32>
    %cst_66 = arith.constant 0.000000e+00 : f32
    %60 = vector.broadcast %cst_66 : f32 to vector<15x32xf32>
    %61 = arith.maximumf %59, %60 : vector<15x32xf32>
    %cst_67 = arith.constant 0.000000e+00 : f32
    %62 = vector.broadcast %cst_67 : f32 to vector<2x64xf32>
    %c0_68 = arith.constant 0 : index
    %c0_69 = arith.constant 0 : index
    %63 = vector.load %arg9[%c0_68, %c0_69] : memref<24x64xf32, #tpu.memory_space<vmem>>, vector<2x64xf32>
    tpu.vector_store %arg9[%c0_68, %c0_69], %62 {strides = array<i32>} : memref<24x64xf32, #tpu.memory_space<vmem>>, vector<2x64xf32>,
    %cst_70 = arith.constant 0.000000e+00 : f32
    %64 = vector.broadcast %cst_70 : f32 to vector<2x64xf32>
    %c15 = arith.constant 15 : index
    %c0_71 = arith.constant 0 : index
    %65 = vector.load %arg9[%c15, %c0_71] : memref<24x64xf32, #tpu.memory_space<vmem>>, vector<2x64xf32>
    tpu.vector_store %arg9[%c15, %c0_71], %64 {strides = array<i32>} : memref<24x64xf32, #tpu.memory_space<vmem>>, vector<2x64xf32>,
    %c2_72 = arith.constant 2 : index
    %c0_73 = arith.constant 0 : index
    %66 = vector.load %arg9[%c2_72, %c0_73] : memref<24x64xf32, #tpu.memory_space<vmem>>, vector<15x32xf32>
    tpu.vector_store %arg9[%c2_72, %c0_73], %61 {strides = array<i32>} : memref<24x64xf32, #tpu.memory_space<vmem>>, vector<15x32xf32>,
    %c0_74 = arith.constant 0 : index
    %c32_75 = arith.constant 32 : index
    %67 = vector.load %arg9[%c0_74, %c32_75] : memref<24x64xf32, #tpu.memory_space<vmem>>, vector<15x32xf32>
    tpu.vector_store %arg9[%c0_74, %c32_75], %61 {strides = array<i32>} : memref<24x64xf32, #tpu.memory_space<vmem>>, vector<15x32xf32>,
    %c0_76 = arith.constant 0 : index
    %c0_77 = arith.constant 0 : index
    %68 = vector.load %arg9[%c0_76, %c0_77] : memref<24x64xf32, #tpu.memory_space<vmem>>, vector<17x64xf32>
    %c1_78 = arith.constant 1 : index
    %c0_79 = arith.constant 0 : index
    %c0_80 = arith.constant 0 : index
    %69 = vector.load %arg4[%c1_78, %c0_79, %c0_80] : memref<4x64x32xf32, #tpu.memory_space<vmem>>, vector<1x64x32xf32>
    %70 = vector.shape_cast %69 : vector<1x64x32xf32> to vector<64x32xf32>
    %cst_81 = arith.constant dense<0.000000e+00> : vector<17x32xf32>
    %71 = tpu.matmul %68, %70, %cst_81 {dimension_numbers = #tpu.dot_dimension_numbers<[1], [0], [0], [1], [0, 0, 1, 1], [], []>} : vector<17x64xf32>, vector<64x32xf32>, vector<17x32xf32> -> vector<17x32xf32>
    %c6 = arith.constant 6 : index
    %c0_82 = arith.constant 0 : index
    %72 = vector.load %arg6[%c6, %c0_82] : memref<24x256xf32, #tpu.memory_space<vmem>>, vector<1x32xf32>
    %73 = vector.broadcast %72 : vector<1x32xf32> to vector<17x32xf32>
    %74 = arith.addf %71, %73 : vector<17x32xf32>
    %cst_83 = arith.constant 0.000000e+00 : f32
    %75 = vector.broadcast %cst_83 : f32 to vector<17x32xf32>
    %76 = arith.maximumf %74, %75 : vector<17x32xf32>
    %c0_84 = arith.constant 0 : index
    %c0_85 = arith.constant 0 : index
    %77 = vector.load %arg8[%c0_84, %c0_85] : memref<24x32xf32, #tpu.memory_space<vmem>>, vector<17x32xf32>
    %c1_86 = arith.constant 1 : index
    %c2_87 = arith.constant 2 : index
    %c0_88 = arith.constant 0 : index
    %c0_89 = arith.constant 0 : index
    %78 = vector.load %arg3[%c1_86, %c2_87, %c0_88, %c0_89] : memref<4x3x32x32xf32, #tpu.memory_space<vmem>>, vector<1x1x32x32xf32>
    %79 = vector.shape_cast %78 : vector<1x1x32x32xf32> to vector<32x32xf32>
    %cst_90 = arith.constant dense<0.000000e+00> : vector<17x32xf32>
    %80 = tpu.matmul %77, %79, %cst_90 {dimension_numbers = #tpu.dot_dimension_numbers<[1], [0], [0], [1], [0, 0, 1, 1], [], []>} : vector<17x32xf32>, vector<32x32xf32>, vector<17x32xf32> -> vector<17x32xf32>
    %c10 = arith.constant 10 : index
    %c0_91 = arith.constant 0 : index
    %81 = vector.load %arg6[%c10, %c0_91] : memref<24x256xf32, #tpu.memory_space<vmem>>, vector<1x32xf32>
    %82 = vector.broadcast %81 : vector<1x32xf32> to vector<17x32xf32>
    %83 = arith.addf %80, %82 : vector<17x32xf32>
    %84 = arith.addf %76, %83 : vector<17x32xf32>
    %c0_92 = arith.constant 0 : index
    %c0_93 = arith.constant 0 : index
    %85 = vector.load %arg8[%c0_92, %c0_93] : memref<24x32xf32, #tpu.memory_space<vmem>>, vector<17x32xf32>
    tpu.vector_store %arg8[%c0_92, %c0_93], %84 {strides = array<i32>} : memref<24x32xf32, #tpu.memory_space<vmem>>, vector<17x32xf32>,
    %c0_94 = arith.constant 0 : index
    %c0_95 = arith.constant 0 : index
    %86 = vector.load %arg8[%c0_94, %c0_95] : memref<24x32xf32, #tpu.memory_space<vmem>>, vector<13x32xf32>
    %c2_96 = arith.constant 2 : index
    %c0_97 = arith.constant 0 : index
    %c0_98 = arith.constant 0 : index
    %c0_99 = arith.constant 0 : index
    %87 = vector.load %arg3[%c2_96, %c0_97, %c0_98, %c0_99] : memref<4x3x32x32xf32, #tpu.memory_space<vmem>>, vector<1x1x32x32xf32>
    %88 = vector.shape_cast %87 : vector<1x1x32x32xf32> to vector<32x32xf32>
    %cst_100 = arith.constant dense<0.000000e+00> : vector<13x32xf32>
    %89 = tpu.matmul %86, %88, %cst_100 {dimension_numbers = #tpu.dot_dimension_numbers<[1], [0], [0], [1], [0, 0, 1, 1], [], []>} : vector<13x32xf32>, vector<32x32xf32>, vector<13x32xf32> -> vector<13x32xf32>
    %c4 = arith.constant 4 : index
    %c0_101 = arith.constant 0 : index
    %90 = vector.load %arg8[%c4, %c0_101] : memref<24x32xf32, #tpu.memory_space<vmem>>, vector<13x32xf32>
    %c2_102 = arith.constant 2 : index
    %c1_103 = arith.constant 1 : index
    %c0_104 = arith.constant 0 : index
    %c0_105 = arith.constant 0 : index
    %91 = vector.load %arg3[%c2_102, %c1_103, %c0_104, %c0_105] : memref<4x3x32x32xf32, #tpu.memory_space<vmem>>, vector<1x1x32x32xf32>
    %92 = vector.shape_cast %91 : vector<1x1x32x32xf32> to vector<32x32xf32>
    %cst_106 = arith.constant dense<0.000000e+00> : vector<13x32xf32>
    %93 = tpu.matmul %90, %92, %cst_106 {dimension_numbers = #tpu.dot_dimension_numbers<[1], [0], [0], [1], [0, 0, 1, 1], [], []>} : vector<13x32xf32>, vector<32x32xf32>, vector<13x32xf32> -> vector<13x32xf32>
    %94 = arith.addf %89, %93 : vector<13x32xf32>
    %c3 = arith.constant 3 : index
    %c0_107 = arith.constant 0 : index
    %95 = vector.load %arg6[%c3, %c0_107] : memref<24x256xf32, #tpu.memory_space<vmem>>, vector<1x32xf32>
    %96 = vector.broadcast %95 : vector<1x32xf32> to vector<13x32xf32>
    %97 = arith.addf %94, %96 : vector<13x32xf32>
    %cst_108 = arith.constant 0.000000e+00 : f32
    %98 = vector.broadcast %cst_108 : f32 to vector<13x32xf32>
    %99 = arith.maximumf %97, %98 : vector<13x32xf32>
    %cst_109 = arith.constant 0.000000e+00 : f32
    %100 = vector.broadcast %cst_109 : f32 to vector<4x64xf32>
    %c0_110 = arith.constant 0 : index
    %c0_111 = arith.constant 0 : index
    %101 = vector.load %arg9[%c0_110, %c0_111] : memref<24x64xf32, #tpu.memory_space<vmem>>, vector<4x64xf32>
    tpu.vector_store %arg9[%c0_110, %c0_111], %100 {strides = array<i32>} : memref<24x64xf32, #tpu.memory_space<vmem>>, vector<4x64xf32>,
    %cst_112 = arith.constant 0.000000e+00 : f32
    %102 = vector.broadcast %cst_112 : f32 to vector<4x64xf32>
    %c13 = arith.constant 13 : index
    %c0_113 = arith.constant 0 : index
    %103 = vector.load %arg9[%c13, %c0_113] : memref<24x64xf32, #tpu.memory_space<vmem>>, vector<4x64xf32>
    tpu.vector_store %arg9[%c13, %c0_113], %102 {strides = array<i32>} : memref<24x64xf32, #tpu.memory_space<vmem>>, vector<4x64xf32>,
    %c4_114 = arith.constant 4 : index
    %c0_115 = arith.constant 0 : index
    %104 = vector.load %arg9[%c4_114, %c0_115] : memref<24x64xf32, #tpu.memory_space<vmem>>, vector<13x32xf32>
    tpu.vector_store %arg9[%c4_114, %c0_115], %99 {strides = array<i32>} : memref<24x64xf32, #tpu.memory_space<vmem>>, vector<13x32xf32>,
    %c0_116 = arith.constant 0 : index
    %c32_117 = arith.constant 32 : index
    %105 = vector.load %arg9[%c0_116, %c32_117] : memref<24x64xf32, #tpu.memory_space<vmem>>, vector<13x32xf32>
    tpu.vector_store %arg9[%c0_116, %c32_117], %99 {strides = array<i32>} : memref<24x64xf32, #tpu.memory_space<vmem>>, vector<13x32xf32>,
    %c0_118 = arith.constant 0 : index
    %c0_119 = arith.constant 0 : index
    %106 = vector.load %arg9[%c0_118, %c0_119] : memref<24x64xf32, #tpu.memory_space<vmem>>, vector<17x64xf32>
    %c2_120 = arith.constant 2 : index
    %c0_121 = arith.constant 0 : index
    %c0_122 = arith.constant 0 : index
    %107 = vector.load %arg4[%c2_120, %c0_121, %c0_122] : memref<4x64x32xf32, #tpu.memory_space<vmem>>, vector<1x64x32xf32>
    %108 = vector.shape_cast %107 : vector<1x64x32xf32> to vector<64x32xf32>
    %cst_123 = arith.constant dense<0.000000e+00> : vector<17x32xf32>
    %109 = tpu.matmul %106, %108, %cst_123 {dimension_numbers = #tpu.dot_dimension_numbers<[1], [0], [0], [1], [0, 0, 1, 1], [], []>} : vector<17x64xf32>, vector<64x32xf32>, vector<17x32xf32> -> vector<17x32xf32>
    %c7 = arith.constant 7 : index
    %c0_124 = arith.constant 0 : index
    %110 = vector.load %arg6[%c7, %c0_124] : memref<24x256xf32, #tpu.memory_space<vmem>>, vector<1x32xf32>
    %111 = vector.broadcast %110 : vector<1x32xf32> to vector<17x32xf32>
    %112 = arith.addf %109, %111 : vector<17x32xf32>
    %cst_125 = arith.constant 0.000000e+00 : f32
    %113 = vector.broadcast %cst_125 : f32 to vector<17x32xf32>
    %114 = arith.maximumf %112, %113 : vector<17x32xf32>
    %c0_126 = arith.constant 0 : index
    %c0_127 = arith.constant 0 : index
    %115 = vector.load %arg8[%c0_126, %c0_127] : memref<24x32xf32, #tpu.memory_space<vmem>>, vector<17x32xf32>
    %c2_128 = arith.constant 2 : index
    %c2_129 = arith.constant 2 : index
    %c0_130 = arith.constant 0 : index
    %c0_131 = arith.constant 0 : index
    %116 = vector.load %arg3[%c2_128, %c2_129, %c0_130, %c0_131] : memref<4x3x32x32xf32, #tpu.memory_space<vmem>>, vector<1x1x32x32xf32>
    %117 = vector.shape_cast %116 : vector<1x1x32x32xf32> to vector<32x32xf32>
    %cst_132 = arith.constant dense<0.000000e+00> : vector<17x32xf32>
    %118 = tpu.matmul %115, %117, %cst_132 {dimension_numbers = #tpu.dot_dimension_numbers<[1], [0], [0], [1], [0, 0, 1, 1], [], []>} : vector<17x32xf32>, vector<32x32xf32>, vector<17x32xf32> -> vector<17x32xf32>
    %c11 = arith.constant 11 : index
    %c0_133 = arith.constant 0 : index
    %119 = vector.load %arg6[%c11, %c0_133] : memref<24x256xf32, #tpu.memory_space<vmem>>, vector<1x32xf32>
    %120 = vector.broadcast %119 : vector<1x32xf32> to vector<17x32xf32>
    %121 = arith.addf %118, %120 : vector<17x32xf32>
    %122 = arith.addf %114, %121 : vector<17x32xf32>
    %c0_134 = arith.constant 0 : index
    %c0_135 = arith.constant 0 : index
    %123 = vector.load %arg8[%c0_134, %c0_135] : memref<24x32xf32, #tpu.memory_space<vmem>>, vector<17x32xf32>
    tpu.vector_store %arg8[%c0_134, %c0_135], %122 {strides = array<i32>} : memref<24x32xf32, #tpu.memory_space<vmem>>, vector<17x32xf32>,
    %c0_136 = arith.constant 0 : index
    %c0_137 = arith.constant 0 : index
    %124 = vector.load %arg8[%c0_136, %c0_137] : memref<24x32xf32, #tpu.memory_space<vmem>>, vector<9x32xf32>
    %c3_138 = arith.constant 3 : index
    %c0_139 = arith.constant 0 : index
    %c0_140 = arith.constant 0 : index
    %c0_141 = arith.constant 0 : index
    %125 = vector.load %arg3[%c3_138, %c0_139, %c0_140, %c0_141] : memref<4x3x32x32xf32, #tpu.memory_space<vmem>>, vector<1x1x32x32xf32>
    %126 = vector.shape_cast %125 : vector<1x1x32x32xf32> to vector<32x32xf32>
    %cst_142 = arith.constant dense<0.000000e+00> : vector<9x32xf32>
    %127 = tpu.matmul %124, %126, %cst_142 {dimension_numbers = #tpu.dot_dimension_numbers<[1], [0], [0], [1], [0, 0, 1, 1], [], []>} : vector<9x32xf32>, vector<32x32xf32>, vector<9x32xf32> -> vector<9x32xf32>
    %c8 = arith.constant 8 : index
    %c0_143 = arith.constant 0 : index
    %128 = vector.load %arg8[%c8, %c0_143] : memref<24x32xf32, #tpu.memory_space<vmem>>, vector<9x32xf32>
    %c3_144 = arith.constant 3 : index
    %c1_145 = arith.constant 1 : index
    %c0_146 = arith.constant 0 : index
    %c0_147 = arith.constant 0 : index
    %129 = vector.load %arg3[%c3_144, %c1_145, %c0_146, %c0_147] : memref<4x3x32x32xf32, #tpu.memory_space<vmem>>, vector<1x1x32x32xf32>
    %130 = vector.shape_cast %129 : vector<1x1x32x32xf32> to vector<32x32xf32>
    %cst_148 = arith.constant dense<0.000000e+00> : vector<9x32xf32>
    %131 = tpu.matmul %128, %130, %cst_148 {dimension_numbers = #tpu.dot_dimension_numbers<[1], [0], [0], [1], [0, 0, 1, 1], [], []>} : vector<9x32xf32>, vector<32x32xf32>, vector<9x32xf32> -> vector<9x32xf32>
    %132 = arith.addf %127, %131 : vector<9x32xf32>
    %c4_149 = arith.constant 4 : index
    %c0_150 = arith.constant 0 : index
    %133 = vector.load %arg6[%c4_149, %c0_150] : memref<24x256xf32, #tpu.memory_space<vmem>>, vector<1x32xf32>
    %134 = vector.broadcast %133 : vector<1x32xf32> to vector<9x32xf32>
    %135 = arith.addf %132, %134 : vector<9x32xf32>
    %cst_151 = arith.constant 0.000000e+00 : f32
    %136 = vector.broadcast %cst_151 : f32 to vector<9x32xf32>
    %137 = arith.maximumf %135, %136 : vector<9x32xf32>
    %cst_152 = arith.constant 0.000000e+00 : f32
    %138 = vector.broadcast %cst_152 : f32 to vector<8x64xf32>
    %c0_153 = arith.constant 0 : index
    %c0_154 = arith.constant 0 : index
    %139 = vector.load %arg9[%c0_153, %c0_154] : memref<24x64xf32, #tpu.memory_space<vmem>>, vector<8x64xf32>
    tpu.vector_store %arg9[%c0_153, %c0_154], %138 {strides = array<i32>} : memref<24x64xf32, #tpu.memory_space<vmem>>, vector<8x64xf32>,
    %cst_155 = arith.constant 0.000000e+00 : f32
    %140 = vector.broadcast %cst_155 : f32 to vector<8x64xf32>
    %c9_156 = arith.constant 9 : index
    %c0_157 = arith.constant 0 : index
    %141 = vector.load %arg9[%c9_156, %c0_157] : memref<24x64xf32, #tpu.memory_space<vmem>>, vector<8x64xf32>
    tpu.vector_store %arg9[%c9_156, %c0_157], %140 {strides = array<i32>} : memref<24x64xf32, #tpu.memory_space<vmem>>, vector<8x64xf32>,
    %c8_158 = arith.constant 8 : index
    %c0_159 = arith.constant 0 : index
    %142 = vector.load %arg9[%c8_158, %c0_159] : memref<24x64xf32, #tpu.memory_space<vmem>>, vector<9x32xf32>
    tpu.vector_store %arg9[%c8_158, %c0_159], %137 {strides = array<i32>} : memref<24x64xf32, #tpu.memory_space<vmem>>, vector<9x32xf32>,
    %c0_160 = arith.constant 0 : index
    %c32_161 = arith.constant 32 : index
    %143 = vector.load %arg9[%c0_160, %c32_161] : memref<24x64xf32, #tpu.memory_space<vmem>>, vector<9x32xf32>
    tpu.vector_store %arg9[%c0_160, %c32_161], %137 {strides = array<i32>} : memref<24x64xf32, #tpu.memory_space<vmem>>, vector<9x32xf32>,
    %c0_162 = arith.constant 0 : index
    %c0_163 = arith.constant 0 : index
    %144 = vector.load %arg9[%c0_162, %c0_163] : memref<24x64xf32, #tpu.memory_space<vmem>>, vector<17x64xf32>
    %c3_164 = arith.constant 3 : index
    %c0_165 = arith.constant 0 : index
    %c0_166 = arith.constant 0 : index
    %145 = vector.load %arg4[%c3_164, %c0_165, %c0_166] : memref<4x64x32xf32, #tpu.memory_space<vmem>>, vector<1x64x32xf32>
    %146 = vector.shape_cast %145 : vector<1x64x32xf32> to vector<64x32xf32>
    %cst_167 = arith.constant dense<0.000000e+00> : vector<17x32xf32>
    %147 = tpu.matmul %144, %146, %cst_167 {dimension_numbers = #tpu.dot_dimension_numbers<[1], [0], [0], [1], [0, 0, 1, 1], [], []>} : vector<17x64xf32>, vector<64x32xf32>, vector<17x32xf32> -> vector<17x32xf32>
    %c8_168 = arith.constant 8 : index
    %c0_169 = arith.constant 0 : index
    %148 = vector.load %arg6[%c8_168, %c0_169] : memref<24x256xf32, #tpu.memory_space<vmem>>, vector<1x32xf32>
    %149 = vector.broadcast %148 : vector<1x32xf32> to vector<17x32xf32>
    %150 = arith.addf %147, %149 : vector<17x32xf32>
    %cst_170 = arith.constant 0.000000e+00 : f32
    %151 = vector.broadcast %cst_170 : f32 to vector<17x32xf32>
    %152 = arith.maximumf %150, %151 : vector<17x32xf32>
    %c0_171 = arith.constant 0 : index
    %c0_172 = arith.constant 0 : index
    %153 = vector.load %arg8[%c0_171, %c0_172] : memref<24x32xf32, #tpu.memory_space<vmem>>, vector<17x32xf32>
    %c3_173 = arith.constant 3 : index
    %c2_174 = arith.constant 2 : index
    %c0_175 = arith.constant 0 : index
    %c0_176 = arith.constant 0 : index
    %154 = vector.load %arg3[%c3_173, %c2_174, %c0_175, %c0_176] : memref<4x3x32x32xf32, #tpu.memory_space<vmem>>, vector<1x1x32x32xf32>
    %155 = vector.shape_cast %154 : vector<1x1x32x32xf32> to vector<32x32xf32>
    %cst_177 = arith.constant dense<0.000000e+00> : vector<17x32xf32>
    %156 = tpu.matmul %153, %155, %cst_177 {dimension_numbers = #tpu.dot_dimension_numbers<[1], [0], [0], [1], [0, 0, 1, 1], [], []>} : vector<17x32xf32>, vector<32x32xf32>, vector<17x32xf32> -> vector<17x32xf32>
    %c12 = arith.constant 12 : index
    %c0_178 = arith.constant 0 : index
    %157 = vector.load %arg6[%c12, %c0_178] : memref<24x256xf32, #tpu.memory_space<vmem>>, vector<1x32xf32>
    %158 = vector.broadcast %157 : vector<1x32xf32> to vector<17x32xf32>
    %159 = arith.addf %156, %158 : vector<17x32xf32>
    %160 = arith.addf %152, %159 : vector<17x32xf32>
    %c0_179 = arith.constant 0 : index
    %c0_180 = arith.constant 0 : index
    %161 = vector.load %arg8[%c0_179, %c0_180] : memref<24x32xf32, #tpu.memory_space<vmem>>, vector<17x32xf32>
    tpu.vector_store %arg8[%c0_179, %c0_180], %160 {strides = array<i32>} : memref<24x32xf32, #tpu.memory_space<vmem>>, vector<17x32xf32>,
    %c14 = arith.constant 14 : index
    %c0_181 = arith.constant 0 : index
    %162 = vector.load %arg8[%c14, %c0_181] : memref<24x32xf32, #tpu.memory_space<vmem>>, vector<2x32xf32>
    %c0_182 = arith.constant 0 : index
    %c0_183 = arith.constant 0 : index
    %163 = vector.load %arg5[%c0_182, %c0_183] : memref<704x256xf32, #tpu.memory_space<vmem>>, vector<32x128xf32>
    %cst_184 = arith.constant dense<0.000000e+00> : vector<2x128xf32>
    %164 = tpu.matmul %162, %163, %cst_184 {dimension_numbers = #tpu.dot_dimension_numbers<[1], [0], [0], [1], [0, 0, 1, 1], [], []>} : vector<2x32xf32>, vector<32x128xf32>, vector<2x128xf32> -> vector<2x128xf32>
    %c15_185 = arith.constant 15 : index
    %c0_186 = arith.constant 0 : index
    %165 = vector.load %arg8[%c15_185, %c0_186] : memref<24x32xf32, #tpu.memory_space<vmem>>, vector<2x32xf32>
    %c32_187 = arith.constant 32 : index
    %c0_188 = arith.constant 0 : index
    %166 = vector.load %arg5[%c32_187, %c0_188] : memref<704x256xf32, #tpu.memory_space<vmem>>, vector<32x128xf32>
    %cst_189 = arith.constant dense<0.000000e+00> : vector<2x128xf32>
    %167 = tpu.matmul %165, %166, %cst_189 {dimension_numbers = #tpu.dot_dimension_numbers<[1], [0], [0], [1], [0, 0, 1, 1], [], []>} : vector<2x32xf32>, vector<32x128xf32>, vector<2x128xf32> -> vector<2x128xf32>
    %168 = arith.addf %164, %167 : vector<2x128xf32>
    %c13_190 = arith.constant 13 : index
    %c0_191 = arith.constant 0 : index
    %169 = vector.load %arg6[%c13_190, %c0_191] : memref<24x256xf32, #tpu.memory_space<vmem>>, vector<1x128xf32>
    %170 = vector.broadcast %169 : vector<1x128xf32> to vector<2x128xf32>
    %171 = arith.addf %168, %170 : vector<2x128xf32>
    %cst_192 = arith.constant 0.000000e+00 : f32
    %172 = vector.broadcast %cst_192 : f32 to vector<2x128xf32>
    %173 = arith.maximumf %171, %172 : vector<2x128xf32>
    %174 = vector.extract_strided_slice %173 {offsets = [0, 0], sizes = [1, 128], strides = [1, 1]} : vector<2x128xf32> to vector<1x128xf32>
    %c64 = arith.constant 64 : index
    %c0_193 = arith.constant 0 : index
    %175 = vector.load %arg5[%c64, %c0_193] : memref<704x256xf32, #tpu.memory_space<vmem>>, vector<128x256xf32>
    %cst_194 = arith.constant dense<0.000000e+00> : vector<1x256xf32>
    %176 = tpu.matmul %174, %175, %cst_194 {dimension_numbers = #tpu.dot_dimension_numbers<[1], [0], [0], [1], [0, 0, 1, 1], [], []>} : vector<1x128xf32>, vector<128x256xf32>, vector<1x256xf32> -> vector<1x256xf32>
    %177 = vector.extract_strided_slice %173 {offsets = [1, 0], sizes = [1, 128], strides = [1, 1]} : vector<2x128xf32> to vector<1x128xf32>
    %c192 = arith.constant 192 : index
    %c0_195 = arith.constant 0 : index
    %178 = vector.load %arg5[%c192, %c0_195] : memref<704x256xf32, #tpu.memory_space<vmem>>, vector<128x256xf32>
    %cst_196 = arith.constant dense<0.000000e+00> : vector<1x256xf32>
    %179 = tpu.matmul %177, %178, %cst_196 {dimension_numbers = #tpu.dot_dimension_numbers<[1], [0], [0], [1], [0, 0, 1, 1], [], []>} : vector<1x128xf32>, vector<128x256xf32>, vector<1x256xf32> -> vector<1x256xf32>
    %180 = arith.addf %176, %179 : vector<1x256xf32>
    %c14_197 = arith.constant 14 : index
    %c0_198 = arith.constant 0 : index
    %181 = vector.load %arg6[%c14_197, %c0_198] : memref<24x256xf32, #tpu.memory_space<vmem>>, vector<1x256xf32>
    %182 = arith.addf %180, %181 : vector<1x256xf32>
    %cst_199 = arith.constant 0.000000e+00 : f32
    %183 = vector.broadcast %cst_199 : f32 to vector<1x256xf32>
    %184 = arith.maximumf %182, %183 : vector<1x256xf32>
    %c320 = arith.constant 320 : index
    %c0_200 = arith.constant 0 : index
    %185 = vector.load %arg5[%c320, %c0_200] : memref<704x256xf32, #tpu.memory_space<vmem>>, vector<256x128xf32>
    %cst_201 = arith.constant dense<0.000000e+00> : vector<1x128xf32>
    %186 = tpu.matmul %184, %185, %cst_201 {dimension_numbers = #tpu.dot_dimension_numbers<[1], [0], [0], [1], [0, 0, 1, 1], [], []>} : vector<1x256xf32>, vector<256x128xf32>, vector<1x128xf32> -> vector<1x128xf32>
    %c15_202 = arith.constant 15 : index
    %c0_203 = arith.constant 0 : index
    %187 = vector.load %arg6[%c15_202, %c0_203] : memref<24x256xf32, #tpu.memory_space<vmem>>, vector<1x128xf32>
    %188 = arith.addf %186, %187 : vector<1x128xf32>
    %cst_204 = arith.constant 0.000000e+00 : f32
    %189 = vector.broadcast %cst_204 : f32 to vector<1x128xf32>
    %190 = arith.maximumf %188, %189 : vector<1x128xf32>
    %c576 = arith.constant 576 : index
    %c0_205 = arith.constant 0 : index
    %191 = vector.load %arg5[%c576, %c0_205] : memref<704x256xf32, #tpu.memory_space<vmem>>, vector<128x6xf32>
    %cst_206 = arith.constant dense<0.000000e+00> : vector<1x6xf32>
    %192 = tpu.matmul %190, %191, %cst_206 {dimension_numbers = #tpu.dot_dimension_numbers<[1], [0], [0], [1], [0, 0, 1, 1], [], []>} : vector<1x128xf32>, vector<128x6xf32>, vector<1x6xf32> -> vector<1x6xf32>
    %c16_207 = arith.constant 16 : index
    %c0_208 = arith.constant 0 : index
    %193 = vector.load %arg6[%c16_207, %c0_208] : memref<24x256xf32, #tpu.memory_space<vmem>>, vector<1x6xf32>
    %194 = arith.addf %192, %193 : vector<1x6xf32>
    %c0_209 = arith.constant 0 : index
    %c0_210 = arith.constant 0 : index
    %c0_211 = arith.constant 0 : index
    %195 = vector.load %arg7[%c0_209, %c0_210, %c0_211] : memref<1x1x6xf32, #tpu.memory_space<vmem>>, vector<1x1x6xf32>
    %196 = vector.shape_cast %195 : vector<1x1x6xf32> to vector<1x6xf32>
    %197 = vector.shape_cast %194 : vector<1x6xf32> to vector<1x1x6xf32>
    tpu.vector_store %arg7[%c0_209, %c0_210, %c0_211], %197 {strides = array<i32>} : memref<1x1x6xf32, #tpu.memory_space<vmem>>, vector<1x1x6xf32>,
    return
  }
  func.func @transform_0(%arg0: i32) -> (i32, i32, i32) {
    %c0_i32 = arith.constant 0 : i32
    %c0_i32_0 = arith.constant 0 : i32
    %c0_i32_1 = arith.constant 0 : i32
    return %arg0, %c0_i32, %c0_i32_0 : i32, i32, i32
  }
  func.func @transform_1(%arg0: i32) -> (i32, i32) {
    %c0_i32 = arith.constant 0 : i32
    %c0_i32_0 = arith.constant 0 : i32
    %c0_i32_1 = arith.constant 0 : i32
    return %c0_i32, %c0_i32_0 : i32, i32
  }
  func.func @transform_2(%arg0: i32) -> (i32, i32, i32, i32) {
    %c0_i32 = arith.constant 0 : i32
    %c0_i32_0 = arith.constant 0 : i32
    %c0_i32_1 = arith.constant 0 : i32
    %c0_i32_2 = arith.constant 0 : i32
    %c0_i32_3 = arith.constant 0 : i32
    return %c0_i32, %c0_i32_0, %c0_i32_1, %c0_i32_2 : i32, i32, i32, i32
  }
  func.func @transform_3(%arg0: i32) -> (i32, i32, i32) {
    %c0_i32 = arith.constant 0 : i32
    %c0_i32_0 = arith.constant 0 : i32
    %c0_i32_1 = arith.constant 0 : i32
    %c0_i32_2 = arith.constant 0 : i32
    return %c0_i32, %c0_i32_0, %c0_i32_1 : i32, i32, i32
  }
  func.func @transform_4(%arg0: i32) -> (i32, i32) {
    %c0_i32 = arith.constant 0 : i32
    %c0_i32_0 = arith.constant 0 : i32
    %c0_i32_1 = arith.constant 0 : i32
    return %c0_i32, %c0_i32_0 : i32, i32
  }
  func.func @transform_5(%arg0: i32) -> (i32, i32) {
    %c0_i32 = arith.constant 0 : i32
    %c0_i32_0 = arith.constant 0 : i32
    %c0_i32_1 = arith.constant 0 : i32
    return %c0_i32, %c0_i32_0 : i32, i32
  }
  func.func @transform_6(%arg0: i32) -> (i32, i32, i32) {
    %c0_i32 = arith.constant 0 : i32
    %c0_i32_0 = arith.constant 0 : i32
    %c0_i32_1 = arith.constant 0 : i32
    return %arg0, %c0_i32, %c0_i32_0 : i32, i32, i32
  }
}

</mosaic_0001>

<bundles_post_ra>
// kernel: wavenet_forward.1
= control target key start
LH: loop header
LB: loop body
LE: loop exit
PB: predicated region body
PF: predicated region fallthrough
CT: control target
= control target key end

     0   :  { %11 = vsyncpa [#allocation5], 0  ;;  %s4622_s0 = inlined_call_operand.vmem [shape: f32[2,17,8], index: 0, kind: input, shape index: {}]   ;;  %s4623_s1 = inlined_call_operand.vmem [shape: f32[8,32], index: 1, kind: input, shape index: {}]   ;;  %s4624_s2 = inlined_call_operand.vmem [shape: f32[4,3,32,32], index: 2, kind: input, shape index: {}]   ;;  %s4625_s3 = inlined_call_operand.vmem [shape: f32[4,64,32], index: 3, kind: input, shape index: {}]   ;;  %s4626_s4 = inlined_call_operand.vmem [shape: f32[704,256], index: 4, kind: input, shape index: {}]   ;;  %s4627_s5 = inlined_call_operand.vmem [shape: f32[24,256], index: 5, kind: input, shape index: {}]   ;;  %s4628_s6 = inlined_call_operand.hbm [shape: f32[2,1,6], index: 6, kind: output, shape index: {}]  }
   0x1   :  { %13 = vsyncpa [#allocation5 + $0x1], 0  ;;  %s3680_s21 = smov 0   ;;  %s3682_s22 = smov 0  }
   0x2   :  { %s3684_s23 = smov 0   ;;  %s3686_s24 = smov 0  }
   0x3 LB: > { %s3701_s25 = sadd.s32 4294967295, %s3638_s24   ;;  %s2622_s26 = sadd.s32 4294967294, %s3638_s24   ;;  %s3638_s24 = sphi %s3686_s24, %s4634_s24   ;;  %s3634_s23 = sphi %s3684_s23, %s4633_s23   ;;  %s3630_s22 = sphi %s3682_s22, %s4632_s22   ;;  %s3626_s21 = sphi %s3680_s21, %s4631_s21  }
   0x4   : > { %s3705_s27 = sadd.s32 1, %s3638_s24   ;;  %s157_s28 = sadd.s32 1, %s3634_s23 }
   0x5   : > { %s154_s29 = ssub.s32 %s3638_s24, %s3705_s27  ;;  %p167_p0 = scmp.ne.s32.totalorder %s3634_s23, %s3630_s22 }
   0x6   : > { %p155_p1 = scmp.eq.s32.totalorder %s154_s29, 0  ;;  %p168_p2 = scmp.eq.s32.totalorder %s3701_s25, 1 }
   0x7   : > { %p173_p3 = scmp.ne.s32.totalorder %s3630_s22, %s3626_s21  ;;  %p174_p4 = scmp.eq.s32.totalorder %s2622_s26, 1 }
   0x8   : > { %s3716_s30 = scalar_select %p155_p1, %s3634_s23, %s157_s28  }
   0x9   : > { %p3718_p5 = por %p168_p2, %p167_p0  ;;  %p3722_p6 = por %p174_p4, %p173_p3 }
   0xa   : > { %p2625_p7 = scmp.ge.s32.totalorder %s3638_s24, 1  ;;  %p215_p8 = scmp.lt.s32.totalorder %s3638_s24, 3 }
   0xc   : > { %p216_p9 = pnand %p2625_p7, %p215_p8 }
   0xd   : > { %v252_v0 = vld [vmem:[%s4623_s1] sm:$0xff] (!%p216_p9)  ;;  %p244_p10 = scmp.lt.s32.totalorder (!%p216_p9), %s3701_s25, 1  ;;  %v3640_v1 = vmov (!%p216_p9), 0.0   ;;  %vm3641_vm0 = vmmov (!%p216_p9), 0   ;;  %vm254_vm1 = vcmask (!%p216_p9), 64512   ;;  %v2631_v6 = vld [vmem:[%s4624_s2 + $0x28] sm:$0xff] (!%p216_p9) }
   0xe   : > { %219 = sbr.rel (%p216_p9) target bundleno = 3504 (0xdb0), region = 44  ;;  %2930 = vmatprep.subr.mxu0 (!%p216_p9), %v3640_v1  ;;  %2932 = vmatprep.mubr.msk.f32.mxu0 (!%p216_p9), %vm3641_vm0, %v3640_v1  ;;  %v2630_v5 = vld [vmem:[%s4624_s2 + $0x20] sm:$0xff] (!%p216_p9)  ;;  %v2632_v8 = vld [vmem:[%s4624_s2 + $0x30] sm:$0xff] (!%p216_p9)  ;;  %v2633_v9 = vld [vmem:[%s4624_s2 + $0x38] sm:$0xff] (!%p216_p9)  ;;  %v3642_v14 = vmov (!%p216_p9), 0.0|0.0   ;;  %vm347_vm2 = vcmask (!%p216_p9), 261120  }
   0xf   : > { %2931 = vmatpush3.msra.mxu0 (!%p216_p9), %v252_v0  ;;  %v3254_v7 = vpack.c.bf16 (!%p216_p9), %v2631_v6, %v2630_v5  ;;  %v3258_v10 = vpack.c.bf16 (!%p216_p9), %v2633_v9, %v2632_v8  ;;  %v354_v11 = vld [vmem:[%s4624_s2] sm:$0xff] (!%p216_p9)  ;;  %v355_v12 = vld [vmem:[%s4624_s2 + $0x8] sm:$0xff] (!%p216_p9)  ;;  %vm350_vm3 = vcmask (!%p216_p9), 253952   ;;  %v356_v29 = vld [vmem:[%s4624_s2 + $0x10] sm:$0xff] (!%p216_p9)  ;;  %vm532_vm4 = vcmask (!%p216_p9), 516096   ;;  %s242_s29 = sand.u32 (!%p216_p9), 1, %s3630_s22  }
  0x10   : > { %v3262_v13 = vpack.c.bf16 (!%p216_p9), %v355_v12, %v354_v11  ;;  %3270 = vmatprep.subr.bf16.mxu0 (!%p216_p9), %v3642_v14  ;;  %v253_v15 = vld [vmem:[%s4627_s5] ss:$0 sm:$0xff] (!%p216_p9)  ;;  %v357_v30 = vld [vmem:[%s4624_s2 + $0x18] sm:$0xff] (!%p216_p9)  ;;  %v2642_v35 = vld [vmem:[%s4624_s2 + $0x48] sm:$0xff] (!%p216_p9)  ;;  %534 = vst.msk [vmem:[#allocation3 + $0x10] sm:$0x1] (!%p216_p9), %vm532_vm4, %v3640_v1 }
  0x11   : > { %3255 = vmatprep.subr.bf16.mxu1 (!%p216_p9), %v3254_v7  ;;  %v3266_v31 = vpack.c.bf16 (!%p216_p9), %v357_v30, %v356_v29  ;;  %v2641_v34 = vld [vmem:[%s4624_s2 + $0x40] sm:$0xff] (!%p216_p9)  ;;  %v2643_v37 = vld [vmem:[%s4624_s2 + $0x50] sm:$0xff] (!%p216_p9)  ;;  %v2644_v38 = vld [vmem:[%s4624_s2 + $0x58] sm:$0xff] (!%p216_p9)  ;;  %533 = vst.msk [vmem:[#allocation3] sm:$0x1] (!%p216_p9), %vm532_vm4, %v3640_v1  ;;  %vm545_vm5 = vcmask (!%p216_p9), 523520  }
  0x12   : > { %3257 = vmatpush3.bf16.msra.mxu1 (!%p216_p9), %v3254_v7  ;;  %v3283_v36 = vpack.c.bf16 (!%p216_p9), %v2642_v35, %v2641_v34  ;;  %v3286_v40 = vpack.c.bf16 (!%p216_p9), %v2644_v38, %v2643_v37  ;;  %v551_v42 = vld [vmem:[%s4625_s3] sm:$0xff] (!%p216_p9)  ;;  %v552_v43 = vld [vmem:[%s4625_s3 + $0x8] sm:$0xff] (!%p216_p9)  ;;  %v553_v44 = vld [vmem:[%s4625_s3 + $0x10] sm:$0xff] (!%p216_p9)  ;;  %vm560_vm6 = vcmask (!%p216_p9), 523264   ;;  %vm938_vm7 = vcmask (!%p216_p9), 517120   ;;  %s2555_s17 = scalar_lea.sflag (!%p216_p9), [#allocation5], %s242_s29 }
  0x13   : > { %3259 = vmatprep.subr.bf16.mxu1 (!%p216_p9), %v3258_v10  ;;  %v3271_v45 = vpack.c.bf16 (!%p216_p9), %v552_v43, %v551_v42  ;;  %v554_v46 = vld [vmem:[%s4625_s3 + $0x18] sm:$0xff] (!%p216_p9)  ;;  %v555_v48 = vld [vmem:[%s4625_s3 + $0x20] sm:$0xff] (!%p216_p9)  ;;  %v556_v49 = vld [vmem:[%s4625_s3 + $0x28] sm:$0xff] (!%p216_p9)  ;;  %vm942_vm8 = vcmask (!%p216_p9), 260096   ;;  %vm953_vm9 = vcmask (!%p216_p9), 522496   ;;  %vm1345_vm10 = vcmask (!%p216_p9), 519168  }
  0x14   : > { %v3274_v47 = vpack.c.bf16 (!%p216_p9), %v554_v46, %v553_v44  ;;  %v3277_v50 = vpack.c.bf16 (!%p216_p9), %v556_v49, %v555_v48  ;;  %v557_v51 = vld [vmem:[%s4625_s3 + $0x30] sm:$0xff] (!%p216_p9)  ;;  %v558_v52 = vld [vmem:[%s4625_s3 + $0x38] sm:$0xff] (!%p216_p9)  ;;  %v527_v54 = vld [vmem:[%s4627_s5 + $0x1] ss:$0 sm:$0xff] (!%p216_p9)  ;;  %vm1349_vm11 = vcmask (!%p216_p9), 258048   ;;  %vm1360_vm12 = vcmask (!%p216_p9), 520448  }
  0x15   : > { %s245_s11 = scalar_select %p244_p10, %s3701_s25, 1  ;;  %v3280_v53 = vpack.c.bf16 %v558_v52, %v557_v51  ;;  %v2652_v9 = vld [vmem:[%s4624_s2 + $0x80] sm:$0xff]  ;;  %v2654_v12 = vld [vmem:[%s4624_s2 + $0x90] sm:$0xff]  ;;  %v2672_v46 = vld [vmem:[%s4624_s2 + $0xa8] sm:$0xff]  ;;  %vm1765_vm13 = vcmask 516352   ;;  %vm2552_vm14 = vcmask 40960  }
  0x16   : > { %3261 = vmatpush3.bf16.msra.mxu1 %v3258_v10  ;;  %v2653_v10 = vld [vmem:[%s4624_s2 + $0x88] sm:$0xff]  ;;  %v2673_v48 = vld [vmem:[%s4624_s2 + $0xb0] sm:$0xff]  ;;  %v2674_v49 = vld [vmem:[%s4624_s2 + $0xb8] sm:$0xff] }
  0x17   : > { %s3532_s12 = smul.u32 24, %s245_s11  ;;  %3263 = vmatprep.subr.bf16.mxu1 %v3262_v13  ;;  %v3288_v11 = vpack.c.bf16 %v2653_v10, %v2652_v9  ;;  %v3320_v51 = vpack.c.bf16 %v2674_v49, %v2673_v48  ;;  %s2741_s11 = sshll.u32 %s3701_s25, 4 }
  0x18   : > { %s4580_s16 = scalar_lea.hbm %s4628_s6, %s2741_s11  ;;  %s3644_s25 = smov [#allocation4]  }
  0x19   : > { %s248_s15 = scalar_lea.vmem %s4622_s0, %s3532_s12  ;;  %s243_s12 = scalar_lea.vmem [#allocation4], %s242_s29 }
  0x1a   : > { %v249_v2 = vld [vmem:[%s248_s15] sm:$0xff]  ;;  %v250_v3 = vld [vmem:[%s248_s15 + $0x8] sm:$0xff]  ;;  %v251_v4 = vld [vmem:[%s248_s15 + $0x10] sm:$0x1]  ;;  %s3643_s15 = smov 32   ;;  %s3580_s19 = sshll.u32 %s3644_s25, 4  ;;  %s3581_s19 = int_to_ptr.vmem [resolvable:$false] %s3580_s19 }
  0x1b   : > { %2933 = vmatmul.mubr.msk.f32.vlgmr.msra.gmra.mrb[0].mxu0 %vm254_vm1, %v249_v2  ;;  %s3582_s20 = scalar_lea.vmem %s3581_s19, 32 }
  0x1c   : > { %2935 = vmatprep.mubr.msk.f32.mxu0 %vm3641_vm0, %v3640_v1  ;;  %3272 = vmatpush3.bf16.msra.mxu0 %v3271_v45  ;;  %v2671_v45 = vld [vmem:[%s4624_s2 + $0xa0] sm:$0xff] }
  0x1d   : > { %3273 = vmatprep.subr.bf16.mxu0 %v3642_v14 }
  0x1f   : > { %2936 = vmatmul.mubr.msk.f32.gmra.mrb[2].mxu0 %vm254_vm1, %v250_v3 }
  0x20   : > { %2938 = vmatprep.mubr.msk.f32.mxu0 %vm3641_vm0, %v3640_v1  ;;  %3275 = vmatpush3.bf16.msra.mxu0 %v3274_v47  ;;  %v3317_v47 = vpack.c.bf16 %v2672_v46, %v2671_v45 }
  0x21   : > { %3276 = vmatprep.subr.bf16.mxu0 %v3642_v14 }
  0x23   : > { %2939 = vmatmul.mubr.msk.f32.gmra.mrb[4].mxu0 %vm254_vm1, %v251_v4 }
  0x24   : > { %2979 = vmatprep.mubr.msk.f32.mxu0 %vm3641_vm0, %v3640_v1  ;;  %3278 = vmatpush3.bf16.msra.mxu0 %v3277_v50 }
  0x25   : > { %3279 = vmatprep.subr.bf16.mxu0 %v3642_v14 }
  0x28   : > { %3281 = vmatpush3.bf16.msra.mxu0 %v3280_v53 }
  0x29   : > { %3289 = vmatprep.subr.bf16.mxu0 %v3288_v11 }
  0xee   : > { %v330_v16 = vpop.f32.mrb[0].mxu0 }
  0xef   : > { %v331_v17 = vadd.f32 %v330_v16, %v253_v15  ;;  %v2934_v18 = vpop.f32.mrb[1].mxu0  ;;  %v2648_v16 = vld [vmem:[%s4624_s2 + $0x60] sm:$0xff] }
  0xf1   : > { %v344_v19 = vmax.f32 %v331_v17, 0.0  ;;  %v2649_v17 = vld [vmem:[%s4624_s2 + $0x68] sm:$0xff] }
  0xf2   : > { %v335_v20 = vpop.f32.mrb[2].mxu0  ;;  %v3296_v18 = vpack.c.bf16 %v2649_v17, %v2648_v16 }
  0xf3   : > { %348 = vst.msk [vmem:[#allocation2] sm:$0xff] %vm347_vm2, %v344_v19  ;;  %v336_v21 = vadd.f32 %v335_v20, %v253_v15  ;;  %v2937_v22 = vpop.f32.mrb[3].mxu0  ;;  %v559_v19 = vld [vmem:[%s4627_s5 + $0x5] ss:$0 sm:$0xff]  ;;  %v661_v20 = vld [vmem:[%s4627_s5 + $0x11] ss:$0 sm:$0xff] }
  0xf5   : > { %v345_v23 = vmax.f32 %v336_v21, 0.0 }
  0xf6   : > { %v340_v24 = vpop.f32.mrb[4].mxu0 }
  0xf7   : > { %349 = vst.msk [vmem:[#allocation2 + $0x8] sm:$0xff] %vm347_vm2, %v345_v23  ;;  %v341_v25 = vadd.f32 %v340_v24, %v253_v15  ;;  %v2940_v26 = vpop.f32.mrb[5].mxu0 }
  0xf9   : > { %v346_v27 = vmax.f32 %v341_v25, 0.0 }
  0xfa   : > { %v352_v33 = vld [vmem:[#allocation2] sm:$0xff] }
  0xfb   : > { %351 = vst.msk [vmem:[#allocation2 + $0x10] sm:$0x1] %vm350_vm3, %v346_v27 }
  0xfe   : > { %v358_v28 = vld [vmem:[#allocation2 + $0x1] sm:$0xff] }
  0xff   : > { %2949 = vmatprep.mubr.msk.f32.mxu1 %vm347_vm2, %v358_v28  ;;  %v353_v39 = vld [vmem:[#allocation2 + $0x8] sm:$0xff] }
 0x102   : > { %v359_v32 = vld [vmem:[#allocation2 + $0x9] sm:$0xff] }
 0x103   : > { %2950 = vmatmul.mubr.msk.f32.vlgmr.msra.gmra.mrb[0].mxu1 %vm347_vm2, %v359_v32  ;;  %v655_v41 = vld [vmem:[#allocation2 + $0x10] sm:$0x1] }
 0x104   : > { %3265 = vmatpush3.bf16.msra.mxu1 %v3262_v13  ;;  %2960 = vmatprep.mubr.msk.f32.mxu1 %vm347_vm2, %v352_v33  ;;  %v2655_v13 = vld [vmem:[%s4624_s2 + $0x98] sm:$0xff] }
 0x105   : > { %3267 = vmatprep.subr.bf16.mxu1 %v3266_v31  ;;  %v3292_v15 = vpack.c.bf16 %v2655_v13, %v2654_v12 }
 0x108   : > { %3269 = vmatpush3.bf16.msra.mxu1 %v3266_v31 }
 0x109   : > { %3282 = vmatprep.subr.bf16.mxu1 %v3642_v14 }
 0x10b   : > { %2961 = vmatmul.mubr.msk.f32.vlgmr.msra.gmra.mrb[0].mxu1 %vm347_vm2, %v353_v39 }
 0x10c   : > { %3284 = vmatpush3.bf16.msra.mxu1 %v3283_v36  ;;  %2996 = vmatprep.mubr.msk.f32.mxu1 %vm3641_vm0, %v3640_v1 }
 0x10d   : > { %3285 = vmatprep.subr.bf16.mxu1 %v3642_v14 }
 0x110   : > { %3287 = vmatpush3.bf16.msra.mxu1 %v3286_v40  ;;  %v2650_v40 = vld [vmem:[%s4624_s2 + $0x70] sm:$0xff] }
 0x111   : > { %3304 = vmatprep.subr.bf16.mxu1 %v3642_v14 }
 0x113   : > { %2997 = vmatmul.mubr.msk.f32.vlgmr.msra.gmra.mrb[2].mxu1 %vm347_vm2, %v352_v33 }
 0x114   : > { %2999 = vmatprep.mubr.msk.f32.mxu1 %vm3641_vm0, %v3640_v1 }
 0x117   : > { %3000 = vmatmul.mubr.msk.f32.gmra.mrb[4].mxu1 %vm347_vm2, %v353_v39 }
 0x118   : > { %3002 = vmatprep.mubr.msk.f32.mxu1 %vm3641_vm0, %v3640_v1 }
 0x11b   : > { %3003 = vmatmul.mubr.msk.f32.gmra.mrb[6].mxu1 %vm347_vm2, %v655_v41  ;;  %v2651_v41 = vld [vmem:[%s4624_s2 + $0x78] sm:$0xff] }
 0x11c   : > { %3043 = vmatprep.mubr.msk.f32.mxu1 %vm3641_vm0, %v3640_v1  ;;  %v3300_v42 = vpack.c.bf16 %v2651_v41, %v2650_v40 }
 0x1de   : > { %v2962_v55 = vpop.f32.mrb[0].mxu1 }
 0x1df   : > { %v529_v56 = vadd.f32 %v2962_v55, %v527_v54  ;;  %v518_v57 = vpop.f32.mrb[1].mxu1  ;;  %v2661_v55 = vld [vmem:[%s4625_s3 + $0x48] sm:$0xff] }
 0x1e0   : > { %v528_v58 = vadd.f32 %v527_v54, %v518_v57  ;;  %v2660_v54 = vld [vmem:[%s4625_s3 + $0x40] sm:$0xff] }
 0x1e1   : > { %v531_v59 = vmax.f32 %v529_v56, 0.0  ;;  %v2662_v56 = vld [vmem:[%s4625_s3 + $0x50] sm:$0xff]  ;;  %v3305_v57 = vpack.c.bf16 %v2661_v55, %v2660_v54 }
 0x1e2   : > { %v530_v60 = vmax.f32 %v528_v58, 0.0  ;;  %v2663_v58 = vld [vmem:[%s4625_s3 + $0x58] sm:$0xff] }
 0x1e3   : > { %536 = vst.msk [vmem:[#allocation3 + $0x9] sm:$0xff] %vm347_vm2, %v531_v59  ;;  %3306 = vmatpush3.bf16.msra.mxu1 %v3305_v57  ;;  %v2701_v57 = vld [vmem:[%s4624_s2 + $0x100] sm:$0xff] }
 0x1e4   : > { %535 = vst.msk [vmem:[#allocation3 + $0x1] sm:$0xff] %vm347_vm2, %v530_v60  ;;  %539 = vrot.lane.b32.xlu0 %v530_v60, %s3643_s15  ;;  %3307 = vmatprep.subr.bf16.mxu1 %v3642_v14  ;;  %v2664_v60 = vld [vmem:[%s4625_s3 + $0x60] sm:$0xff] }
 0x1e6   : > { %v737_v61 = vpop.f32.mrb[2].mxu1 }
 0x1e7   : > { %v2998_v62 = vpop.f32.mrb[3].mxu1  ;;  %v738_v24 = vadd.f32 %v737_v61, %v661_v20  ;;  %v2665_v61 = vld [vmem:[%s4625_s3 + $0x68] sm:$0xff] }
 0x1e8   : > { %541 = vrot.lane.b32.xlu0 %v531_v59, %s3643_s15  ;;  %v3308_v59 = vpack.c.bf16 %v2663_v58, %v2662_v56  ;;  %v3311_v62 = vpack.c.bf16 %v2665_v61, %v2664_v60  ;;  %v2702_v58 = vld [vmem:[%s4624_s2 + $0x108] sm:$0xff]  ;;  %v2703_v60 = vld [vmem:[%s4624_s2 + $0x110] sm:$0xff]  ;;  %v2704_v61 = vld [vmem:[%s4624_s2 + $0x118] sm:$0xff] }
 0x1ea   : > { %v742_v63 = vpop.f32.mrb[4].mxu1  ;;  %v550_v8 = vld [vmem:[#allocation3 + $0x10] sm:$0x1]  ;;  %3309 = vmatpush3.bf16.msra.mxu1 %v3308_v59  ;;  %v3351_v59 = vpack.c.bf16 %v2702_v58, %v2701_v57 }
 0x1eb   : > { %v3001_v0 = vpop.f32.mrb[5].mxu1  ;;  %v743_v30 = vadd.f32 %v742_v63, %v661_v20  ;;  %3310 = vmatprep.subr.bf16.mxu1 %v3642_v14  ;;  %v2666_v63 = vld [vmem:[%s4625_s3 + $0x70] sm:$0xff] }
 0x1ec   : > { %v2667_v0 = vld [vmem:[%s4625_s3 + $0x78] sm:$0xff] }
 0x1ee   : > { %v747_v2 = vpop.f32.mrb[6].mxu1  ;;  %3312 = vmatpush3.bf16.msra.mxu1 %v3311_v62 }
 0x1ef   : > { %v3004_v3 = vpop.f32.mrb[7].mxu1  ;;  %v748_v36 = vadd.f32 %v747_v2, %v661_v20  ;;  %3313 = vmatprep.subr.bf16.mxu1 %v3642_v14  ;;  %v3314_v2 = vpack.c.bf16 %v2667_v0, %v2666_v63  ;;  %v3354_v63 = vpack.c.bf16 %v2704_v61, %v2703_v60 }
 0x1f0   : > { %v933_v3 = vld [vmem:[%s4627_s5 + $0x2] ss:$0 sm:$0xff] }
 0x1f2   : > { %3315 = vmatpush3.bf16.msra.mxu1 %v3314_v2 }
 0x256   : > { %v540_v4 = vpop.permute.xlu0 %539 }
 0x257   : > { %546 = vst.msk [vmem:[#allocation3] sm:$0xff] %vm545_vm5, %v540_v4 }
 0x25a   : > { %v542_v5 = vpop.permute.xlu0 %541 }
 0x25b   : > { %547 = vst.msk [vmem:[#allocation3 + $0x8] sm:$0xff] %vm545_vm5, %v542_v5 }
 0x25e   : > { %v548_v6 = vld [vmem:[#allocation3] sm:$0xff] }
 0x25f   : > { %939 = vst.msk [vmem:[#allocation3] sm:$0x3] %vm938_vm7, %v3640_v1  ;;  %2980 = vmatmul.mubr.msk.f32.vlgmr.msra.gmra.mrb[6].mxu0 %vm560_vm6, %v548_v6 }
 0x260   : > { %2982 = vmatprep.mubr.msk.f32.mxu0 %vm3641_vm0, %v3640_v1  ;;  %3291 = vmatpush3.bf16.msra.mxu0 %v3288_v11 }
 0x261   : > { %3293 = vmatprep.subr.bf16.mxu0 %v3292_v15 }
 0x262   : > { %v549_v7 = vld [vmem:[#allocation3 + $0x8] sm:$0xff] }
 0x263   : > { %2983 = vmatmul.mubr.msk.f32.gmra.mrb[8].mxu0 %vm560_vm6, %v549_v7  ;;  %940 = vst.msk [vmem:[#allocation3 + $0xf] sm:$0x3] %vm938_vm7, %v3640_v1 }
 0x264   : > { %2985 = vmatprep.mubr.msk.f32.mxu0 %vm3641_vm0, %v3640_v1  ;;  %3295 = vmatpush3.bf16.msra.mxu0 %v3292_v15 }
 0x265   : > { %3297 = vmatprep.subr.bf16.mxu0 %v3296_v18 }
 0x267   : > { %2986 = vmatmul.mubr.msk.f32.gmra.mrb[10].mxu0 %vm560_vm6, %v550_v8 }
 0x332   : > { %v636_v21 = vpop.f32.mrb[6].mxu0 }
 0x333   : > { %v637_v22 = vadd.f32 %v636_v21, %v559_v19  ;;  %v2981_v23 = vpop.f32.mrb[7].mxu0 }
 0x334   : > { %v2683_v23 = vld [vmem:[%s4624_s2 + $0xe8] sm:$0xff] }
 0x335   : > { %v650_v25 = vmax.f32 %v637_v22, 0.0  ;;  %v2682_v22 = vld [vmem:[%s4624_s2 + $0xe0] sm:$0xff] }
 0x336   : > { %v641_v26 = vpop.f32.mrb[8].mxu0 }
 0x337   : > { %v751_v27 = vadd.f32 %v738_v24, %v650_v25  ;;  %v642_v28 = vadd.f32 %v641_v26, %v559_v19  ;;  %v2984_v29 = vpop.f32.mrb[9].mxu0  ;;  %v3322_v24 = vpack.c.bf16 %v2683_v23, %v2682_v22  ;;  %v2684_v25 = vld [vmem:[%s4624_s2 + $0xf0] sm:$0xff]  ;;  %v2685_v26 = vld [vmem:[%s4624_s2 + $0xf8] sm:$0xff] }
 0x338   : > { %v2679_v29 = vld [vmem:[%s4624_s2 + $0xc8] sm:$0xff] }
 0x339   : > { %754 = vst.msk [vmem:[#allocation2] sm:$0xff] %vm347_vm2, %v751_v27  ;;  %v651_v31 = vmax.f32 %v642_v28, 0.0  ;;  %3323 = vmatprep.subr.bf16.mxu1 %v3322_v24  ;;  %v3326_v27 = vpack.c.bf16 %v2685_v26, %v2684_v25  ;;  %v2678_v28 = vld [vmem:[%s4624_s2 + $0xc0] sm:$0xff] }
 0x33a   : > { %v646_v32 = vpop.f32.mrb[10].mxu0 }
 0x33b   : > { %v752_v33 = vadd.f32 %v743_v30, %v651_v31  ;;  %v647_v34 = vadd.f32 %v646_v32, %v559_v19  ;;  %v2987_v35 = vpop.f32.mrb[11].mxu0  ;;  %v3330_v30 = vpack.c.bf16 %v2679_v29, %v2678_v28  ;;  %v967_v31 = vld [vmem:[%s4627_s5 + $0x6] ss:$0 sm:$0xff]  ;;  %v1068_v32 = vld [vmem:[%s4627_s5 + $0x12] ss:$0 sm:$0xff] }
 0x33d   : > { %755 = vst.msk [vmem:[#allocation2 + $0x8] sm:$0xff] %vm347_vm2, %v752_v33  ;;  %v652_v37 = vmax.f32 %v647_v34, 0.0 }
 0x33f   : > { %v753_v38 = vadd.f32 %v748_v36, %v652_v37 }
 0x340   : > { %v757_v44 = vld [vmem:[#allocation2] sm:$0xff] }
 0x341   : > { %756 = vst.msk [vmem:[#allocation2 + $0x10] sm:$0x1] %vm350_vm3, %v753_v38 }
 0x344   : > { %v764_v39 = vld [vmem:[#allocation2 + $0x2] sm:$0xff] }
 0x345   : > { %3013 = vmatprep.mubr.msk.f32.mxu0 %vm347_vm2, %v764_v39  ;;  %v758_v50 = vld [vmem:[#allocation2 + $0x8] sm:$0x7f] }
 0x346   : > { %v1061_v52 = vld [vmem:[#allocation2 + $0x8] sm:$0xff] }
 0x348   : > { %v765_v43 = vld [vmem:[#allocation2 + $0xa] sm:$0x7f] }
 0x349   : > { %3014 = vmatmul.mubr.msk.f32.vlgmr.msra.gmra.mrb[12].mxu0 %vm347_vm2, %v765_v43  ;;  %v1062_v53 = vld [vmem:[#allocation2 + $0x10] sm:$0x1] }
 0x34a   : > { %3299 = vmatpush3.bf16.msra.mxu0 %v3296_v18  ;;  %3024 = vmatprep.mubr.msk.f32.mxu0 %vm347_vm2, %v757_v44 }
 0x34b   : > { %3301 = vmatprep.subr.bf16.mxu0 %v3300_v42 }
 0x34e   : > { %3303 = vmatpush3.bf16.msra.mxu0 %v3300_v42 }
 0x34f   : > { %3316 = vmatprep.subr.bf16.mxu0 %v3642_v14 }
 0x351   : > { %3025 = vmatmul.mubr.msk.f32.vlgmr.msra.gmra.mrb[12].mxu0 %vm347_vm2, %v758_v50 }
 0x352   : > { %3318 = vmatpush3.bf16.msra.mxu0 %v3317_v47  ;;  %3060 = vmatprep.mubr.msk.f32.mxu0 %vm3641_vm0, %v3640_v1 }
 0x353   : > { %3319 = vmatprep.subr.bf16.mxu0 %v3642_v14 }
 0x356   : > { %3321 = vmatpush3.bf16.msra.mxu0 %v3320_v51 }
 0x357   : > { %3338 = vmatprep.subr.bf16.mxu0 %v3642_v14 }
 0x359   : > { %3061 = vmatmul.mubr.msk.f32.vlgmr.msra.gmra.mrb[14].mxu0 %vm347_vm2, %v757_v44 }
 0x35a   : > { %3063 = vmatprep.mubr.msk.f32.mxu0 %vm3641_vm0, %v3640_v1 }
 0x35d   : > { %3064 = vmatmul.mubr.msk.f32.gmra.mrb[16].mxu0 %vm347_vm2, %v1061_v52  ;;  %v2680_v52 = vld [vmem:[%s4624_s2 + $0xd0] sm:$0xff] }
 0x35e   : > { %3066 = vmatprep.mubr.msk.f32.mxu0 %vm3641_vm0, %v3640_v1 }
 0x361   : > { %3067 = vmatmul.mubr.msk.f32.gmra.mrb[18].mxu0 %vm347_vm2, %v1062_v53  ;;  %v2681_v53 = vld [vmem:[%s4624_s2 + $0xd8] sm:$0xff] }
 0x362   : > { %3107 = vmatprep.mubr.msk.f32.mxu0 %vm3641_vm0, %v3640_v1  ;;  %v3334_v54 = vpack.c.bf16 %v2681_v53, %v2680_v52 }
 0x424   : > { %v3026_v4 = vpop.f32.mrb[12].mxu0 }
 0x425   : > { %v935_v5 = vadd.f32 %v3026_v4, %v933_v3  ;;  %v924_v6 = vpop.f32.mrb[13].mxu0  ;;  %v2691_v4 = vld [vmem:[%s4625_s3 + $0x88] sm:$0xff] }
 0x426   : > { %v934_v7 = vadd.f32 %v933_v3, %v924_v6  ;;  %v2690_v3 = vld [vmem:[%s4625_s3 + $0x80] sm:$0xff] }
 0x427   : > { %v937_v8 = vmax.f32 %v935_v5, 0.0  ;;  %v2692_v5 = vld [vmem:[%s4625_s3 + $0x90] sm:$0xff]  ;;  %v3339_v6 = vpack.c.bf16 %v2691_v4, %v2690_v3 }
 0x428   : > { %v936_v9 = vmax.f32 %v934_v7, 0.0  ;;  %v2693_v7 = vld [vmem:[%s4625_s3 + $0x98] sm:$0xff] }
 0x429   : > { %943 = vst.msk [vmem:[#allocation3 + $0xa] sm:$0x7f] %vm942_vm8, %v937_v8  ;;  %3340 = vmatpush3.bf16.msra.mxu0 %v3339_v6  ;;  %v2731_v6 = vld [vmem:[%s4624_s2 + $0x160] sm:$0xff] }
 0x42a   : > { %941 = vst.msk [vmem:[#allocation3 + $0x2] sm:$0xff] %vm347_vm2, %v936_v9  ;;  %946 = vrot.lane.b32.xlu1 %v936_v9, %s3643_s15  ;;  %3341 = vmatprep.subr.bf16.mxu0 %v3642_v14  ;;  %v2694_v9 = vld [vmem:[%s4625_s3 + $0xa0] sm:$0xff] }
 0x42c   : > { %v1144_v10 = vpop.f32.mrb[14].mxu0 }
 0x42d   : > { %v3062_v11 = vpop.f32.mrb[15].mxu0  ;;  %v1145_v36 = vadd.f32 %v1144_v10, %v1068_v32  ;;  %v2695_v10 = vld [vmem:[%s4625_s3 + $0xa8] sm:$0xff] }
 0x42e   : > { %948 = vrot.lane.b32.xlu1 %v937_v8, %s3643_s15  ;;  %v3342_v8 = vpack.c.bf16 %v2693_v7, %v2692_v5  ;;  %v3345_v11 = vpack.c.bf16 %v2695_v10, %v2694_v9  ;;  %v2732_v7 = vld [vmem:[%s4624_s2 + $0x168] sm:$0xff]  ;;  %v2733_v9 = vld [vmem:[%s4624_s2 + $0x170] sm:$0xff]  ;;  %v2734_v10 = vld [vmem:[%s4624_s2 + $0x178] sm:$0xff] }
 0x430   : > { %v1149_v12 = vpop.f32.mrb[16].mxu0  ;;  %v957_v21 = vld [vmem:[#allocation3 + $0x10] sm:$0x1]  ;;  %3343 = vmatpush3.bf16.msra.mxu0 %v3342_v8  ;;  %v3385_v8 = vpack.c.bf16 %v2732_v7, %v2731_v6 }
 0x431   : > { %v3065_v13 = vpop.f32.mrb[17].mxu0  ;;  %v1150_v42 = vadd.f32 %v1149_v12, %v1068_v32  ;;  %3344 = vmatprep.subr.bf16.mxu0 %v3642_v14  ;;  %v2696_v12 = vld [vmem:[%s4625_s3 + $0xb0] sm:$0xff] }
 0x432   : > { %v2697_v13 = vld [vmem:[%s4625_s3 + $0xb8] sm:$0xff] }
 0x434   : > { %v1154_v15 = vpop.f32.mrb[18].mxu0  ;;  %3346 = vmatpush3.bf16.msra.mxu0 %v3345_v11 }
 0x435   : > { %v3068_v16 = vpop.f32.mrb[19].mxu0  ;;  %v1155_v48 = vadd.f32 %v1154_v15, %v1068_v32  ;;  %v3348_v15 = vpack.c.bf16 %v2697_v13, %v2696_v12  ;;  %3347 = vmatprep.subr.bf16.mxu0 %v3642_v14  ;;  %v3388_v12 = vpack.c.bf16 %v2734_v10, %v2733_v9 }
 0x436   : > { %v1340_v16 = vld [vmem:[%s4627_s5 + $0x3] ss:$0 sm:$0xff] }
 0x438   : > { %3349 = vmatpush3.bf16.msra.mxu0 %v3348_v15  ;;  %v2720_v15 = vld [vmem:[%s4625_s3 + $0xc0] sm:$0xff] }
 0x49c   : > { %v947_v17 = vpop.permute.xlu1 %946 }
 0x49d   : > { %952 = vst.msk [vmem:[#allocation3] sm:$0xff] %vm545_vm5, %v947_v17 }
 0x4a0   : > { %v949_v18 = vpop.permute.xlu1 %948 }
 0x4a1   : > { %954 = vst.msk [vmem:[#allocation3 + $0x8] sm:$0x7f] %vm953_vm9, %v949_v18 }
 0x4a4   : > { %v955_v19 = vld [vmem:[#allocation3] sm:$0xff] }
 0x4a5   : > { %3044 = vmatmul.mubr.msk.f32.vlgmr.msra.gmra.mrb[8].mxu1 %vm560_vm6, %v955_v19  ;;  %1346 = vst.msk [vmem:[#allocation3] sm:$0xf] %vm1345_vm10, %v3640_v1 }
 0x4a6   : > { %3046 = vmatprep.mubr.msk.f32.mxu1 %vm3641_vm0, %v3640_v1  ;;  %3325 = vmatpush3.bf16.msra.mxu1 %v3322_v24 }
 0x4a7   : > { %3327 = vmatprep.subr.bf16.mxu1 %v3326_v27 }
 0x4a8   : > { %v956_v20 = vld [vmem:[#allocation3 + $0x8] sm:$0xff] }
 0x4a9   : > { %3047 = vmatmul.mubr.msk.f32.gmra.mrb[10].mxu1 %vm560_vm6, %v956_v20  ;;  %1347 = vst.msk [vmem:[#allocation3 + $0xd] sm:$0xf] %vm1345_vm10, %v3640_v1 }
 0x4aa   : > { %3049 = vmatprep.mubr.msk.f32.mxu1 %vm3641_vm0, %v3640_v1  ;;  %3329 = vmatpush3.bf16.msra.mxu1 %v3326_v27 }
 0x4ab   : > { %3331 = vmatprep.subr.bf16.mxu1 %v3330_v30 }
 0x4ad   : > { %3050 = vmatmul.mubr.msk.f32.gmra.mrb[12].mxu1 %vm560_vm6, %v957_v21 }
 0x578   : > { %v1043_v33 = vpop.f32.mrb[8].mxu1 }
 0x579   : > { %v1044_v34 = vadd.f32 %v1043_v33, %v967_v31  ;;  %v3045_v35 = vpop.f32.mrb[9].mxu1 }
 0x57a   : > { %v2713_v35 = vld [vmem:[%s4624_s2 + $0x148] sm:$0xff] }
 0x57b   : > { %v1057_v37 = vmax.f32 %v1044_v34, 0.0  ;;  %v2712_v34 = vld [vmem:[%s4624_s2 + $0x140] sm:$0xff] }
 0x57c   : > { %v1048_v38 = vpop.f32.mrb[10].mxu1 }
 0x57d   : > { %v1158_v39 = vadd.f32 %v1145_v36, %v1057_v37  ;;  %v1049_v40 = vadd.f32 %v1048_v38, %v967_v31  ;;  %v3048_v41 = vpop.f32.mrb[11].mxu1  ;;  %v3356_v36 = vpack.c.bf16 %v2713_v35, %v2712_v34  ;;  %v2714_v37 = vld [vmem:[%s4624_s2 + $0x150] sm:$0xff]  ;;  %v2715_v38 = vld [vmem:[%s4624_s2 + $0x158] sm:$0xff] }
 0x57e   : > { %v2709_v41 = vld [vmem:[%s4624_s2 + $0x128] sm:$0xff] }
 0x57f   : > { %1161 = vst.msk [vmem:[#allocation2] sm:$0xff] %vm347_vm2, %v1158_v39  ;;  %v1058_v43 = vmax.f32 %v1049_v40, 0.0  ;;  %3357 = vmatprep.subr.bf16.mxu0 %v3356_v36  ;;  %v3360_v39 = vpack.c.bf16 %v2715_v38, %v2714_v37  ;;  %v2708_v40 = vld [vmem:[%s4624_s2 + $0x120] sm:$0xff] }
 0x580   : > { %v1053_v44 = vpop.f32.mrb[12].mxu1 }
 0x581   : > { %v1159_v45 = vadd.f32 %v1150_v42, %v1058_v43  ;;  %v1054_v46 = vadd.f32 %v1053_v44, %v967_v31  ;;  %v3051_v47 = vpop.f32.mrb[13].mxu1  ;;  %v3364_v42 = vpack.c.bf16 %v2709_v41, %v2708_v40  ;;  %v1374_v43 = vld [vmem:[%s4627_s5 + $0x7] ss:$0 sm:$0xff]  ;;  %v1475_v44 = vld [vmem:[%s4627_s5 + $0x13] ss:$0 sm:$0xff] }
 0x583   : > { %1162 = vst.msk [vmem:[#allocation2 + $0x8] sm:$0xff] %vm347_vm2, %v1159_v45  ;;  %v1059_v49 = vmax.f32 %v1054_v46, 0.0 }
 0x585   : > { %v1160_v50 = vadd.f32 %v1155_v48, %v1059_v49 }
 0x586   : > { %v1164_v56 = vld [vmem:[#allocation2] sm:$0xff] }
 0x587   : > { %1163 = vst.msk [vmem:[#allocation2 + $0x10] sm:$0x1] %vm350_vm3, %v1160_v50 }
 0x58a   : > { %v1171_v51 = vld [vmem:[#allocation2 + $0x4] sm:$0xff] }
 0x58b   : > { %3077 = vmatprep.mubr.msk.f32.mxu1 %vm347_vm2, %v1171_v51  ;;  %v1165_v62 = vld [vmem:[#allocation2 + $0x8] sm:$0x1f] }
 0x58c   : > { %v1468_v0 = vld [vmem:[#allocation2 + $0x8] sm:$0xff] }
 0x58e   : > { %v1172_v55 = vld [vmem:[#allocation2 + $0xc] sm:$0x1f] }
 0x58f   : > { %3078 = vmatmul.mubr.msk.f32.vlgmr.msra.gmra.mrb[14].mxu1 %vm347_vm2, %v1172_v55  ;;  %v1469_v2 = vld [vmem:[#allocation2 + $0x10] sm:$0x1] }
 0x590   : > { %3333 = vmatpush3.bf16.msra.mxu1 %v3330_v30  ;;  %3088 = vmatprep.mubr.msk.f32.mxu1 %vm347_vm2, %v1164_v56 }
 0x591   : > { %3335 = vmatprep.subr.bf16.mxu1 %v3334_v54 }
 0x594   : > { %3337 = vmatpush3.bf16.msra.mxu1 %v3334_v54 }
 0x595   : > { %3350 = vmatprep.subr.bf16.mxu1 %v3642_v14 }
 0x597   : > { %3089 = vmatmul.mubr.msk.f32.vlgmr.msra.gmra.mrb[14].mxu1 %vm347_vm2, %v1165_v62 }
 0x598   : > { %3352 = vmatpush3.bf16.msra.mxu1 %v3351_v59  ;;  %3124 = vmatprep.mubr.msk.f32.mxu1 %vm3641_vm0, %v3640_v1 }
 0x599   : > { %3353 = vmatprep.subr.bf16.mxu1 %v3642_v14 }
 0x59c   : > { %3355 = vmatpush3.bf16.msra.mxu1 %v3354_v63 }
 0x59d   : > { %3372 = vmatprep.subr.bf16.mxu1 %v3642_v14 }
 0x59f   : > { %3125 = vmatmul.mubr.msk.f32.vlgmr.msra.gmra.mrb[16].mxu1 %vm347_vm2, %v1164_v56 }
 0x5a0   : > { %3127 = vmatprep.mubr.msk.f32.mxu1 %vm3641_vm0, %v3640_v1 }
 0x5a3   : > { %3128 = vmatmul.mubr.msk.f32.gmra.mrb[18].mxu1 %vm347_vm2, %v1468_v0  ;;  %v2710_v0 = vld [vmem:[%s4624_s2 + $0x130] sm:$0xff] }
 0x5a4   : > { %3130 = vmatprep.mubr.msk.f32.mxu1 %vm3641_vm0, %v3640_v1 }
 0x5a7   : > { %3131 = vmatmul.mubr.msk.f32.gmra.mrb[20].mxu1 %vm347_vm2, %v1469_v2  ;;  %v2711_v2 = vld [vmem:[%s4624_s2 + $0x138] sm:$0xff] }
 0x5a8   : > { %3171 = vmatprep.mubr.msk.f32.mxu1 %vm3641_vm0, %v3640_v1  ;;  %v3368_v3 = vpack.c.bf16 %v2711_v2, %v2710_v0 }
 0x66a   : > { %v3090_v17 = vpop.f32.mrb[14].mxu1 }
 0x66b   : > { %v1342_v18 = vadd.f32 %v3090_v17, %v1340_v16  ;;  %v1331_v19 = vpop.f32.mrb[15].mxu1  ;;  %v2722_v17 = vld [vmem:[%s4625_s3 + $0xd0] sm:$0xff] }
 0x66c   : > { %v1341_v20 = vadd.f32 %v1340_v16, %v1331_v19  ;;  %v2721_v16 = vld [vmem:[%s4625_s3 + $0xc8] sm:$0xff]  ;;  %v2723_v19 = vld [vmem:[%s4625_s3 + $0xd8] sm:$0xff] }
 0x66d   : > { %v1344_v21 = vmax.f32 %v1342_v18, 0.0  ;;  %v3373_v18 = vpack.c.bf16 %v2721_v16, %v2720_v15 }
 0x66e   : > { %v1343_v22 = vmax.f32 %v1341_v20, 0.0  ;;  %v3376_v20 = vpack.c.bf16 %v2723_v19, %v2722_v17  ;;  %v2169_v19 = vld [vmem:[%s4626_s4 + $0x190] sm:$0xff] }
 0x66f   : > { %1355 = vrot.lane.b32.xlu1 %v1344_v21, %s3643_s15  ;;  %1350 = vst.msk [vmem:[#allocation3 + $0xc] sm:$0x1f] %vm1349_vm11, %v1344_v21  ;;  %3374 = vmatpush3.bf16.msra.mxu1 %v3373_v18  ;;  %v2724_v21 = vld [vmem:[%s4625_s3 + $0xe0] sm:$0xff] }
 0x670   : > { %1348 = vst.msk [vmem:[#allocation3 + $0x4] sm:$0xff] %vm347_vm2, %v1343_v22  ;;  %1353 = vrot.lane.b32.xlu0 %v1343_v22, %s3643_s15  ;;  %3375 = vmatprep.subr.bf16.mxu1 %v3642_v14  ;;  %v2725_v22 = vld [vmem:[%s4625_s3 + $0xe8] sm:$0xff]  ;;  %v2167_v18 = vld [vmem:[%s4626_s4 + $0x180] sm:$0xff] }
 0x672   : > { %v1551_v23 = vpop.f32.mrb[16].mxu1 }
 0x673   : > { %v3126_v24 = vpop.f32.mrb[17].mxu1  ;;  %v1552_v48 = vadd.f32 %v1551_v23, %v1475_v44  ;;  %3377 = vmatpush3.bf16.msra.mxu1 %v3376_v20  ;;  %v3379_v23 = vpack.c.bf16 %v2725_v22, %v2724_v21  ;;  %v2172_v21 = vld [vmem:[%s4626_s4 + $0x1a8] sm:$0xff]  ;;  %v2174_v22 = vld [vmem:[%s4626_s4 + $0x1b8] sm:$0xff] }
 0x674   : > { %3378 = vmatprep.subr.bf16.mxu1 %v3642_v14  ;;  %v2726_v24 = vld [vmem:[%s4625_s3 + $0xf0] sm:$0xff] }
 0x676   : > { %v1556_v25 = vpop.f32.mrb[18].mxu1  ;;  %v1364_v32 = vld [vmem:[#allocation3 + $0x10] sm:$0x1] }
 0x677   : > { %v3129_v26 = vpop.f32.mrb[19].mxu1  ;;  %v1557_v54 = vadd.f32 %v1556_v25, %v1475_v44  ;;  %v2727_v25 = vld [vmem:[%s4625_s3 + $0xf8] sm:$0xff]  ;;  %3380 = vmatpush3.bf16.msra.mxu1 %v3379_v23  ;;  %v3404_v23 = vpack.c.bf16 %v2169_v19, %v2167_v18  ;;  %v2382_v18 = vld [vmem:[%s4626_s4 + $0x3d0] sm:$0xff] }
 0x678   : > { %v3382_v26 = vpack.c.bf16 %v2727_v25, %v2726_v24  ;;  %3381 = vmatprep.subr.bf16.mxu1 %v3642_v14  ;;  %v3406_v24 = vpack.c.bf16 %v2174_v22, %v2172_v21  ;;  %v2171_v25 = vld [vmem:[%s4626_s4 + $0x1a0] sm:$0xff]  ;;  %v2366_v22 = vld [vmem:[%s4626_s4 + $0x2d0] sm:$0xff] }
 0x679   : > { %v2365_v21 = vld [vmem:[%s4626_s4 + $0x2c0] sm:$0xff] }
 0x67a   : > { %v1561_v27 = vpop.f32.mrb[20].mxu1 }
 0x67b   : > { %v3132_v28 = vpop.f32.mrb[21].mxu1  ;;  %v1562_v60 = vadd.f32 %v1561_v27, %v1475_v44  ;;  %v1747_v27 = vld [vmem:[%s4627_s5 + $0x4] ss:$0 sm:$0xff]  ;;  %3383 = vmatpush3.bf16.msra.mxu1 %v3382_v26  ;;  %v2173_v26 = vld [vmem:[%s4626_s4 + $0x1b0] sm:$0xff] }
 0x67c   : > { %3390 = vmatprep.subr.bf16.mxu1 %v3642_v14 }
 0x6e1   : > { %v1356_v29 = vpop.permute.xlu1 %1355 }
 0x6e2   : > { %1361 = vst.msk [vmem:[#allocation3 + $0x8] sm:$0x1f] %vm1360_vm12, %v1356_v29  ;;  %v1354_v30 = vpop.permute.xlu0 %1353 }
 0x6e3   : > { %1359 = vst.msk [vmem:[#allocation3] sm:$0xff] %vm545_vm5, %v1354_v30 }
 0x6e9   : > { %v1363_v31 = vld [vmem:[#allocation3 + $0x8] sm:$0xff] }
 0x6ea   : > { %v1362_v33 = vld [vmem:[#allocation3] sm:$0xff]  ;;  %1753 = vst.msk [vmem:[#allocation3 + $0x9] sm:$0xff] %vm560_vm6, %v3640_v1 }
 0x6eb   : > { %3108 = vmatmul.mubr.msk.f32.vlgmr.msra.gmra.mrb[20].mxu0 %vm560_vm6, %v1362_v33  ;;  %1752 = vst.msk [vmem:[#allocation3] sm:$0xff] %vm560_vm6, %v3640_v1 }
 0x6ec   : > { %3110 = vmatprep.mubr.msk.f32.mxu0 %vm3641_vm0, %v3640_v1  ;;  %3359 = vmatpush3.bf16.msra.mxu0 %v3356_v36 }
 0x6ed   : > { %3361 = vmatprep.subr.bf16.mxu0 %v3360_v39 }
 0x6ef   : > { %3111 = vmatmul.mubr.msk.f32.gmra.mrb[22].mxu0 %vm560_vm6, %v1363_v31 }
 0x6f0   : > { %3113 = vmatprep.mubr.msk.f32.mxu0 %vm3641_vm0, %v3640_v1  ;;  %3363 = vmatpush3.bf16.msra.mxu0 %v3360_v39 }
 0x6f1   : > { %3365 = vmatprep.subr.bf16.mxu0 %v3364_v42 }
 0x6f3   : > { %3114 = vmatmul.mubr.msk.f32.gmra.mrb[24].mxu0 %vm560_vm6, %v1364_v32 }
 0x7be   : > { %v1450_v45 = vpop.f32.mrb[20].mxu0 }
 0x7bf   : > { %v1451_v46 = vadd.f32 %v1450_v45, %v1374_v43  ;;  %v3109_v47 = vpop.f32.mrb[21].mxu0  ;;  %v1977_v45 = vld [vmem:[%s4626_s4] sm:$0xff] }
 0x7c1   : > { %v1464_v49 = vmax.f32 %v1451_v46, 0.0  ;;  %v1978_v46 = vld [vmem:[%s4626_s4 + $0x10] sm:$0xff] }
 0x7c2   : > { %v1455_v50 = vpop.f32.mrb[22].mxu0  ;;  %v3397_v47 = vpack.c.bf16 %v1978_v46, %v1977_v45  ;;  %v2185_v45 = vld [vmem:[%s4626_s4 + $0x210] sm:$0xff] }
 0x7c3   : > { %v1565_v51 = vadd.f32 %v1552_v48, %v1464_v49  ;;  %v1456_v52 = vadd.f32 %v1455_v50, %v1374_v43  ;;  %v3112_v53 = vpop.f32.mrb[23].mxu0  ;;  %v1982_v48 = vld [vmem:[%s4626_s4 + $0x40] sm:$0xff]  ;;  %v1983_v49 = vld [vmem:[%s4626_s4 + $0x50] sm:$0xff] }
 0x7c4   : > { %v1979_v50 = vld [vmem:[%s4626_s4 + $0x20] sm:$0xff] }
 0x7c5   : > { %1568 = vst.msk [vmem:[#allocation2] sm:$0xff] %vm347_vm2, %v1565_v51  ;;  %v1465_v55 = vmax.f32 %v1456_v52, 0.0  ;;  %v3391_v51 = vpack.c.bf16 %v1983_v49, %v1982_v48  ;;  %v1980_v52 = vld [vmem:[%s4626_s4 + $0x30] sm:$0xff]  ;;  %v1984_v53 = vld [vmem:[%s4626_s4 + $0x60] sm:$0xff]  ;;  %v2190_v48 = vld [vmem:[%s4626_s4 + $0x238] sm:$0xff] }
 0x7c6   : > { %v1460_v56 = vpop.f32.mrb[24].mxu0 }
 0x7c7   : > { %v1566_v57 = vadd.f32 %v1557_v54, %v1465_v55  ;;  %v1461_v58 = vadd.f32 %v1460_v56, %v1374_v43  ;;  %v3115_v59 = vpop.f32.mrb[25].mxu0  ;;  %v1985_v54 = vld [vmem:[%s4626_s4 + $0x70] sm:$0xff]  ;;  %v3400_v55 = vpack.c.bf16 %v1980_v52, %v1979_v50  ;;  %v2187_v50 = vld [vmem:[%s4626_s4 + $0x220] sm:$0xff] }
 0x7c8   : > { %v3394_v56 = vpack.c.bf16 %v1985_v54, %v1984_v53  ;;  %v2192_v53 = vld [vmem:[%s4626_s4 + $0x248] sm:$0xff]  ;;  %v2194_v54 = vld [vmem:[%s4626_s4 + $0x258] sm:$0xff] }
 0x7c9   : > { %1569 = vst.msk [vmem:[#allocation2 + $0x8] sm:$0xff] %vm347_vm2, %v1566_v57  ;;  %v1466_v61 = vmax.f32 %v1461_v58, 0.0  ;;  %v2168_v57 = vld [vmem:[%s4626_s4 + $0x188] sm:$0xff]  ;;  %v2170_v58 = vld [vmem:[%s4626_s4 + $0x198] sm:$0xff] }
 0x7ca   : > { %v3402_v59 = vpack.c.bf16 %v2170_v58, %v2168_v57  ;;  %v2193_v57 = vld [vmem:[%s4626_s4 + $0x250] sm:$0xff] }
 0x7cb   : > { %v1567_v62 = vadd.f32 %v1562_v60, %v1466_v61  ;;  %v1779_v60 = vld [vmem:[%s4627_s5 + $0x10] ss:$0 sm:$0xff]  ;;  %v1880_v61 = vld [vmem:[%s4627_s5 + $0x14] ss:$0 sm:$0xff] }
 0x7cc   : > { %v1571_v5 = vld [vmem:[#allocation2] sm:$0xff] }
 0x7cd   : > { %1570 = vst.msk [vmem:[#allocation2 + $0x10] sm:$0x1] %vm350_vm3, %v1567_v62 }
 0x7d0   : > { %v1578_v63 = vld [vmem:[#allocation2 + $0x8] sm:$0xff] }
 0x7d1   : > { %3141 = vmatprep.mubr.msk.f32.mxu0 %vm347_vm2, %v1578_v63  ;;  %v1572_v11 = vld [vmem:[#allocation2 + $0x8] sm:$0x1] }
 0x7d4   : > { %v1579_v4 = vld [vmem:[#allocation2 + $0x10] sm:$0x1] }
 0x7d5   : > { %3142 = vmatmul.mubr.msk.f32.vlgmr.msra.gmra.mrb[26].mxu0 %vm347_vm2, %v1579_v4  ;;  %v1874_v13 = vld [vmem:[#allocation2 + $0x10] sm:$0x1] }
 0x7d6   : > { %3367 = vmatpush3.bf16.msra.mxu0 %v3364_v42  ;;  %3152 = vmatprep.mubr.msk.f32.mxu0 %vm347_vm2, %v1571_v5 }
 0x7d7   : > { %3369 = vmatprep.subr.bf16.mxu0 %v3368_v3 }
 0x7da   : > { %3371 = vmatpush3.bf16.msra.mxu0 %v3368_v3 }
 0x7db   : > { %3384 = vmatprep.subr.bf16.mxu0 %v3642_v14 }
 0x7dd   : > { %3153 = vmatmul.mubr.msk.f32.vlgmr.msra.gmra.mrb[26].mxu0 %vm347_vm2, %v1572_v11 }
 0x7de   : > { %3386 = vmatpush3.bf16.msra.mxu0 %v3385_v8  ;;  %3188 = vmatprep.mubr.msk.f32.mxu0 %vm3641_vm0, %v3640_v1 }
 0x7df   : > { %3387 = vmatprep.subr.bf16.mxu0 %v3642_v14 }
 0x7e2   : > { %3389 = vmatpush3.bf16.msra.mxu0 %v3388_v12 }
 0x7e3   : > { %3396 = vmatprep.subr.bf16.mxu0 %v3642_v14 }
 0x7e5   : > { %3189 = vmatmul.mubr.msk.f32.vlgmr.msra.gmra.mrb[28].mxu0 %vm347_vm2, %v1571_v5 }
 0x7e6   : > { %3191 = vmatprep.mubr.msk.f32.mxu0 %vm3641_vm0, %v3640_v1  ;;  %3398 = vmatpush3.bf16.msra.mxu0 %v3397_v47  ;;  %v2188_v47 = vld [vmem:[%s4626_s4 + $0x228] sm:$0xff] }
 0x7e7   : > { %3399 = vmatprep.subr.bf16.mxu0 %v3642_v14  ;;  %v3422_v49 = vpack.c.bf16 %v2190_v48, %v2188_v47  ;;  %v2132_v48 = vld [vmem:[%s4627_s5 + $0x15] ss:$0 sm:$0xff] }
 0x7e9   : > { %3192 = vmatmul.mubr.msk.f32.gmra.mrb[30].mxu0 %vm347_vm2, %v1578_v63 }
 0x7ea   : > { %3194 = vmatprep.mubr.msk.f32.mxu0 %vm3641_vm0, %v3640_v1  ;;  %3401 = vmatpush3.bf16.msra.mxu0 %v3400_v55  ;;  %v3426_v55 = vpack.c.bf16 %v2194_v54, %v2192_v53  ;;  %v2137_v53 = vld [vmem:[%s4626_s4 + $0x90] sm:$0xff]  ;;  %v2140_v54 = vld [vmem:[%s4626_s4 + $0xa8] sm:$0xff] }
 0x7ed   : > { %3195 = vmatmul.mubr.msk.f32.gmra.mrb[32].mxu0 %vm347_vm2, %v1874_v13 }
 0x7ee   : > { %3216 = vmatprep.mubr.msk.f32.mxu0 %vm3641_vm0, %v3640_v1 }
 0x8b0   : > { %v3154_v28 = vpop.f32.mrb[26].mxu0 }
 0x8b1   : > { %v1749_v29 = vadd.f32 %v3154_v28, %v1747_v27  ;;  %v1738_v30 = vpop.f32.mrb[27].mxu0  ;;  %v2176_v28 = vld [vmem:[%s4626_s4 + $0x1c8] sm:$0xff] }
 0x8b2   : > { %v1748_v31 = vadd.f32 %v1747_v27, %v1738_v30  ;;  %v3408_v30 = vpack.c.bf16 %v2173_v26, %v2171_v25  ;;  %v3476_v25 = vpack.c.bf16 %v2366_v22, %v2365_v21  ;;  %v2155_v22 = vld [vmem:[%s4626_s4 + $0x120] sm:$0xff] }
 0x8b3   : > { %v1751_v32 = vmax.f32 %v1749_v29, 0.0  ;;  %v2178_v29 = vld [vmem:[%s4626_s4 + $0x1d8] sm:$0xff] }
 0x8b4   : > { %v1750_v33 = vmax.f32 %v1748_v31, 0.0  ;;  %v3410_v31 = vpack.c.bf16 %v2178_v29, %v2176_v28  ;;  %v2368_v28 = vld [vmem:[%s4626_s4 + $0x2f0] sm:$0xff]  ;;  %v2385_v29 = vld [vmem:[%s4626_s4 + $0x400] sm:$0xff] }
 0x8b5   : > { %1755 = vst.msk [vmem:[#allocation3 + $0x10] sm:$0x1] %vm350_vm3, %v1751_v32  ;;  %1760 = vrot.lane.b32.xlu1 %v1751_v32, %s3643_s15  ;;  %v2175_v32 = vld [vmem:[%s4626_s4 + $0x1c0] sm:$0xff] }
 0x8b6   : > { %1754 = vst.msk [vmem:[#allocation3 + $0x8] sm:$0xff] %vm347_vm2, %v1750_v33  ;;  %1758 = vrot.lane.b32.xlu0 %v1750_v33, %s3643_s15  ;;  %v2177_v33 = vld [vmem:[%s4626_s4 + $0x1d0] sm:$0xff]  ;;  %s2567_s15 = sshll.u32 %s243_s12, 4  ;;  %s4582_s15 = int_to_ptr.vmem [resolvable:$true] %s2567_s15 }
 0x8b7   : > { %s3576_s18 = scalar_lea.vmem %s4582_s15, 16  ;;  %p3583_p0 = scmp.lt.s32.totalorder %s4582_s15, %s3581_s19 }
 0x8b8   : > { %v1956_v34 = vpop.f32.mrb[28].mxu0  ;;  %p3577_p11 = scmp.ne.s32.totalorder %s4582_s15, %s3576_s18  ;;  %p3584_p1 = scmp.lt.s32.totalorder %s3582_s20, %s3576_s18 }
 0x8b9   : > { %v3190_v35 = vpop.f32.mrb[29].mxu0  ;;  %v1957_v2 = vadd.f32 %v1956_v34, %v1880_v61  ;;  %v2180_v34 = vld [vmem:[%s4626_s4 + $0x1e8] sm:$0xff] }
 0x8ba   : > { %v2182_v35 = vld [vmem:[%s4626_s4 + $0x1f8] sm:$0xff]  ;;  %p3578_p12 = pnand %p3577_p11, %p3718_p5  ;;  %p3585_p2 = por %p3584_p1, %p3583_p0 }
 0x8bc   : > { %v1961_v36 = vpop.f32.mrb[30].mxu0  ;;  %v1769_v44 = vld [vmem:[#allocation3 + $0x10] sm:$0x1]  ;;  %p3579_p13 = pneg %p3578_p12 }
 0x8bd   : > { %v3193_v37 = vpop.f32.mrb[31].mxu0  ;;  %v1962_v8 = vadd.f32 %v1961_v36, %v1880_v61  ;;  %v3412_v36 = vpack.c.bf16 %v2177_v33, %v2175_v32  ;;  %v2369_v33 = vld [vmem:[%s4626_s4 + $0x300] sm:$0xff] }
 0x8be   : > { %v3414_v37 = vpack.c.bf16 %v2182_v35, %v2180_v34  ;;  %v2370_v34 = vld [vmem:[%s4626_s4 + $0x310] sm:$0xff]  ;;  %v2387_v35 = vld [vmem:[%s4626_s4 + $0x420] sm:$0xff]  ;;  %p3586_p3 = pnand %p3585_p2, %p3579_p13 }
 0x8c0   : > { %v1966_v38 = vpop.f32.mrb[32].mxu0 }
 0x8c1   : > { %v3196_v39 = vpop.f32.mrb[33].mxu0  ;;  %v1967_v15 = vadd.f32 %v1966_v38, %v1880_v61  ;;  %v2179_v38 = vld [vmem:[%s4626_s4 + $0x1e0] sm:$0xff] }
 0x8c2   : > { %v2181_v39 = vld [vmem:[%s4626_s4 + $0x1f0] sm:$0xff] }
 0x927   : > { %v1761_v40 = vpop.permute.xlu1 %1760 }
 0x928   : > { %1766 = vst.msk [vmem:[#allocation3 + $0x8] sm:$0x1] %vm1765_vm13, %v1761_v40  ;;  %v1759_v41 = vpop.permute.xlu0 %1758  ;;  %v2184_v40 = vld [vmem:[%s4626_s4 + $0x208] sm:$0xff] }
 0x929   : > { %1764 = vst.msk [vmem:[#allocation3] sm:$0xff] %vm545_vm5, %v1759_v41  ;;  %v2186_v41 = vld [vmem:[%s4626_s4 + $0x218] sm:$0xff] }
 0x92f   : > { %v1768_v43 = vld [vmem:[#allocation3 + $0x8] sm:$0xff] }
 0x930   : > { %v1767_v42 = vld [vmem:[#allocation3] sm:$0xff] }
 0x931   : > { %3172 = vmatmul.mubr.msk.f32.vlgmr.msra.gmra.mrb[22].mxu1 %vm560_vm6, %v1767_v42  ;;  %v3416_v42 = vpack.c.bf16 %v2181_v39, %v2179_v38  ;;  %v2371_v39 = vld [vmem:[%s4626_s4 + $0x320] sm:$0xff] }
 0x932   : > { %3174 = vmatprep.mubr.msk.f32.mxu1 %vm3641_vm0, %v3640_v1  ;;  %3392 = vmatpush3.bf16.msra.mxu1 %v3391_v51  ;;  %v2189_v51 = vld [vmem:[%s4626_s4 + $0x230] sm:$0xff] }
 0x933   : > { %3393 = vmatprep.subr.bf16.mxu1 %v3642_v14  ;;  %v3424_v52 = vpack.c.bf16 %v2189_v51, %v2187_v50 }
 0x935   : > { %3175 = vmatmul.mubr.msk.f32.gmra.mrb[24].mxu1 %vm560_vm6, %v1768_v43  ;;  %v3418_v43 = vpack.c.bf16 %v2186_v41, %v2184_v40  ;;  %v2372_v40 = vld [vmem:[%s4626_s4 + $0x330] sm:$0xff]  ;;  %v2389_v41 = vld [vmem:[%s4626_s4 + $0x440] sm:$0xff] }
 0x936   : > { %3177 = vmatprep.mubr.msk.f32.mxu1 %vm3641_vm0, %v3640_v1  ;;  %3395 = vmatpush3.bf16.msra.mxu1 %v3394_v56  ;;  %v2191_v56 = vld [vmem:[%s4626_s4 + $0x240] sm:$0xff] }
 0x937   : > { %3403 = vmatprep.subr.bf16.mxu1 %v3402_v59  ;;  %v3428_v58 = vpack.c.bf16 %v2193_v57, %v2191_v56  ;;  %v2196_v59 = vld [vmem:[%s4626_s4 + $0x268] sm:$0xff] }
 0x939   : > { %3178 = vmatmul.mubr.msk.f32.gmra.mrb[26].mxu1 %vm560_vm6, %v1769_v44  ;;  %v2183_v44 = vld [vmem:[%s4626_s4 + $0x200] sm:$0xff] }
 0x93a   : > { %3205 = vmatprep.mubr.msk.f32.mxu1 %vm3641_vm0, %v3640_v1  ;;  %v3420_v46 = vpack.c.bf16 %v2185_v45, %v2183_v44 }
 0xa04   : > { %v1855_v62 = vpop.f32.mrb[22].mxu1 }
 0xa05   : > { %v1856_v63 = vadd.f32 %v1855_v62, %v1779_v60  ;;  %v3173_v0 = vpop.f32.mrb[23].mxu1  ;;  %v2195_v62 = vld [vmem:[%s4626_s4 + $0x260] sm:$0xff] }
 0xa07   : > { %v1869_v3 = vmax.f32 %v1856_v63, 0.0  ;;  %v2197_v63 = vld [vmem:[%s4626_s4 + $0x270] sm:$0xff] }
 0xa08   : > { %v1860_v4 = vpop.f32.mrb[24].mxu1  ;;  %v3432_v0 = vpack.c.bf16 %v2197_v63, %v2195_v62  ;;  %v2144_v62 = vld [vmem:[%s4626_s4 + $0xc8] sm:$0xff]  ;;  %v2146_v63 = vld [vmem:[%s4626_s4 + $0xd8] sm:$0xff] }
 0xa09   : > { %v1970_v5 = vadd.f32 %v1957_v2, %v1869_v3  ;;  %v1861_v6 = vadd.f32 %v1860_v4, %v1779_v60  ;;  %v3176_v7 = vpop.f32.mrb[25].mxu1  ;;  %v2136_v2 = vld [vmem:[%s4626_s4 + $0x88] sm:$0xff]  ;;  %v2138_v3 = vld [vmem:[%s4626_s4 + $0x98] sm:$0xff] }
 0xa0a   : > { %v3434_v4 = vpack.c.bf16 %v2138_v3, %v2136_v2  ;;  %v2361_v7 = vld [vmem:[%s4626_s4 + $0x280] sm:$0xff]  ;;  %v3442_v2 = vpack.c.bf16 %v2146_v63, %v2144_v62  ;;  %v2468_v63 = vld [vmem:[%s4626_s4 + $0x4b0] sm:$0xff] }
 0xa0b   : > { %1973 = vst.msk [vmem:[#allocation2] sm:$0xff] %vm347_vm2, %v1970_v5  ;;  %v1870_v9 = vmax.f32 %v1861_v6, 0.0  ;;  %v2377_v5 = vld [vmem:[%s4626_s4 + $0x380] sm:$0xff]  ;;  %v2378_v6 = vld [vmem:[%s4626_s4 + $0x390] sm:$0xff] }
 0xa0c   : > { %v1865_v10 = vpop.f32.mrb[26].mxu1  ;;  %v2143_v3 = vld [vmem:[%s4626_s4 + $0xc0] sm:$0xff] }
 0xa0d   : > { %v1971_v11 = vadd.f32 %v1962_v8, %v1870_v9  ;;  %v1866_v12 = vadd.f32 %v1865_v10, %v1779_v60  ;;  %v3179_v13 = vpop.f32.mrb[27].mxu1  ;;  %v2198_v60 = vld [vmem:[%s4626_s4 + $0x278] sm:$0xff]  ;;  %v3466_v8 = vpack.c.bf16 %v2378_v6, %v2377_v5  ;;  %v2362_v9 = vld [vmem:[%s4626_s4 + $0x290] sm:$0xff]  ;;  %v2379_v10 = vld [vmem:[%s4626_s4 + $0x3a0] sm:$0xff] }
 0xa0e   : > { %v3430_v61 = vpack.c.bf16 %v2198_v60, %v2196_v59  ;;  %v2139_v60 = vld [vmem:[%s4626_s4 + $0xa0] sm:$0xff]  ;;  %v2148_v5 = vld [vmem:[%s4626_s4 + $0xe8] sm:$0xff]  ;;  %v2150_v6 = vld [vmem:[%s4626_s4 + $0xf8] sm:$0xff] }
 0xa0f   : > { %1974 = vst.msk [vmem:[#allocation2 + $0x8] sm:$0xff] %vm347_vm2, %v1971_v11  ;;  %v1871_v16 = vmax.f32 %v1866_v12, 0.0  ;;  %v2380_v11 = vld [vmem:[%s4626_s4 + $0x3b0] sm:$0xff]  ;;  %v3468_v12 = vpack.c.bf16 %v2362_v9, %v2361_v7  ;;  %3467 = vmatprep.subr.bf16.mxu0 %v3466_v8  ;;  %v3446_v8 = vpack.c.bf16 %v2150_v6, %v2148_v5  ;;  %v2147_v9 = vld [vmem:[%s4626_s4 + $0xe0] sm:$0xff] }
 0xa10   : > { %v3470_v13 = vpack.c.bf16 %v2380_v11, %v2379_v10  ;;  %v2149_v10 = vld [vmem:[%s4626_s4 + $0xf0] sm:$0xff]  ;;  %v2152_v11 = vld [vmem:[%s4626_s4 + $0x108] sm:$0xff]  ;;  %v2467_v62 = vld [vmem:[%s4626_s4 + $0x4a0] sm:$0xff] }
 0xa11   : > { %v1972_v17 = vadd.f32 %v1967_v15, %v1871_v16  ;;  %v2363_v15 = vld [vmem:[%s4626_s4 + $0x2a0] sm:$0xff]  ;;  %v2364_v16 = vld [vmem:[%s4626_s4 + $0x2b0] sm:$0xff] }
 0xa12   : > { %v3472_v19 = vpack.c.bf16 %v2364_v16, %v2363_v15  ;;  %v2151_v16 = vld [vmem:[%s4626_s4 + $0x100] sm:$0xff] }
 0xa13   : > { %1975 = vst.msk [vmem:[#allocation2 + $0x10] sm:$0x1] %vm350_vm3, %v1972_v17  ;;  %v2381_v17 = vld [vmem:[%s4626_s4 + $0x3c0] sm:$0xff] }
 0xa14   : > { %v2471_v5 = vld [vmem:[%s4626_s4 + $0x4e0] sm:$0xff] }
 0xa16   : > { %v1976_v20 = vld [vmem:[#allocation2 + $0xe] sm:$0x3] }
 0xa17   : > { %3217 = vmatmul.mubr.msk.f32.vlgmr.msra.gmra.mrb[34].mxu0 %vm347_vm2, %v1976_v20  ;;  %v3474_v20 = vpack.c.bf16 %v2382_v18, %v2381_v17  ;;  %v2153_v17 = vld [vmem:[%s4626_s4 + $0x110] sm:$0xff]  ;;  %v2156_v18 = vld [vmem:[%s4626_s4 + $0x128] sm:$0xff] }
 0xa18   : > { %3469 = vmatpush3.bf16.msra.mxu0 %v3468_v12  ;;  %v2154_v12 = vld [vmem:[%s4626_s4 + $0x118] sm:$0xff] }
 0xa19   : > { %3471 = vmatprep.subr.bf16.mxu0 %v3470_v13  ;;  %v3448_v13 = vpack.c.bf16 %v2149_v10, %v2147_v9  ;;  %v3450_v15 = vpack.c.bf16 %v2154_v12, %v2152_v11  ;;  %v2475_v10 = vld [vmem:[%s4626_s4 + $0x520] sm:$0xff]  ;;  %v2476_v11 = vld [vmem:[%s4626_s4 + $0x530] sm:$0xff] }
 0xa1a   : > { %v1981_v27 = vld [vmem:[#allocation2 + $0xf] sm:$0x3]  ;;  %v3514_v12 = vpack.c.bf16 %v2476_v11, %v2475_v10 }
 0xa1b   : > { %3206 = vmatmul.mubr.msk.f32.vlgmr.msra.gmra.mrb[28].mxu1 %vm347_vm2, %v1981_v27  ;;  %v2367_v27 = vld [vmem:[%s4626_s4 + $0x2e0] sm:$0xff] }
 0xa1c   : > { %3405 = vmatpush1.bf16.msra.mxu1 %v3404_v23  ;;  %2266 = vmatprep.mubr.f32.mxu1 %v3640_v1  ;;  %v2383_v23 = vld [vmem:[%s4626_s4 + $0x3e0] sm:$0xff] }
 0xa1d   : > { %3407 = vmatprep.subr.bf16.mxu1 %v3406_v24  ;;  %v2384_v24 = vld [vmem:[%s4626_s4 + $0x3f0] sm:$0xff]  ;;  %3473 = vmatpush3.bf16.msra.mxu0 %v3472_v19  ;;  %v2158_v19 = vld [vmem:[%s4626_s4 + $0x138] sm:$0xff] }
 0xa1e   : > { %3475 = vmatprep.subr.bf16.mxu0 %v3474_v20  ;;  %v3478_v26 = vpack.c.bf16 %v2384_v24, %v2383_v23  ;;  %v3452_v20 = vpack.c.bf16 %v2153_v17, %v2151_v16  ;;  %v3454_v21 = vpack.c.bf16 %v2158_v19, %v2156_v18  ;;  %v2157_v23 = vld [vmem:[%s4626_s4 + $0x130] sm:$0xff]  ;;  %v2160_v24 = vld [vmem:[%s4626_s4 + $0x148] sm:$0xff]  ;;  %v2479_v17 = vld [vmem:[%s4626_s4 + $0x560] sm:$0xff] }
 0xa1f   : > { %v2480_v18 = vld [vmem:[%s4626_s4 + $0x570] sm:$0xff] }
 0xa20   : > { %3409 = vmatpush1.bf16.msra.mxu1 %v3408_v30  ;;  %v2386_v30 = vld [vmem:[%s4626_s4 + $0x410] sm:$0xff]  ;;  %v3520_v19 = vpack.c.bf16 %v2480_v18, %v2479_v17 }
 0xa21   : > { %3411 = vmatprep.subr.bf16.mxu1 %v3410_v31  ;;  %3477 = vmatpush3.bf16.msra.mxu0 %v3476_v25  ;;  %v3480_v31 = vpack.c.bf16 %v2368_v28, %v2367_v27  ;;  %v3482_v32 = vpack.c.bf16 %v2386_v30, %v2385_v29  ;;  %v2162_v25 = vld [vmem:[%s4626_s4 + $0x158] sm:$0xff]  ;;  %v2159_v28 = vld [vmem:[%s4626_s4 + $0x140] sm:$0xff]  ;;  %v2161_v29 = vld [vmem:[%s4626_s4 + $0x150] sm:$0xff] }
 0xa22   : > { %3479 = vmatprep.subr.bf16.mxu0 %v3478_v26  ;;  %v3456_v26 = vpack.c.bf16 %v2157_v23, %v2155_v22  ;;  %v3458_v27 = vpack.c.bf16 %v2162_v25, %v2160_v24  ;;  %v2164_v30 = vld [vmem:[%s4626_s4 + $0x168] sm:$0xff] }
 0xa24   : > { %3413 = vmatpush1.bf16.msra.mxu1 %v3412_v36  ;;  %v2388_v36 = vld [vmem:[%s4626_s4 + $0x430] sm:$0xff] }
 0xa25   : > { %3415 = vmatprep.subr.bf16.mxu1 %v3414_v37  ;;  %3481 = vmatpush3.bf16.msra.mxu0 %v3480_v31  ;;  %v3484_v37 = vpack.c.bf16 %v2370_v34, %v2369_v33  ;;  %v3486_v38 = vpack.c.bf16 %v2388_v36, %v2387_v35  ;;  %v2166_v31 = vld [vmem:[%s4626_s4 + $0x178] sm:$0xff]  ;;  %v2163_v34 = vld [vmem:[%s4626_s4 + $0x160] sm:$0xff]  ;;  %v2165_v35 = vld [vmem:[%s4626_s4 + $0x170] sm:$0xff] }
 0xa26   : > { %3483 = vmatprep.subr.bf16.mxu0 %v3482_v32  ;;  %v3460_v32 = vpack.c.bf16 %v2161_v29, %v2159_v28  ;;  %v3462_v33 = vpack.c.bf16 %v2166_v31, %v2164_v30  ;;  %v3464_v36 = vpack.c.bf16 %v2165_v35, %v2163_v34 }
 0xa28   : > { %3417 = vmatpush1.bf16.msra.mxu1 %v3416_v42  ;;  %v2390_v42 = vld [vmem:[%s4626_s4 + $0x450] sm:$0xff] }
 0xa29   : > { %3419 = vmatprep.subr.bf16.mxu1 %v3418_v43  ;;  %3485 = vmatpush3.bf16.msra.mxu0 %v3484_v37  ;;  %v3488_v43 = vpack.c.bf16 %v2372_v40, %v2371_v39  ;;  %v3490_v44 = vpack.c.bf16 %v2390_v42, %v2389_v41  ;;  %v2373_v37 = vld [vmem:[%s4626_s4 + $0x340] sm:$0xff]  ;;  %v2392_v41 = vld [vmem:[%s4626_s4 + $0x470] sm:$0xff] }
 0xa2a   : > { %3487 = vmatprep.subr.bf16.mxu0 %v3486_v38  ;;  %v2374_v38 = vld [vmem:[%s4626_s4 + $0x350] sm:$0xff]  ;;  %v2391_v40 = vld [vmem:[%s4626_s4 + $0x460] sm:$0xff] }
 0xa2b   : > { %v3492_v39 = vpack.c.bf16 %v2374_v38, %v2373_v37  ;;  %v3494_v42 = vpack.c.bf16 %v2392_v41, %v2391_v40 }
 0xa2c   : > { %3421 = vmatpush1.bf16.msra.mxu1 %v3420_v46 }
 0xa2d   : > { %3423 = vmatprep.subr.bf16.mxu1 %v3422_v49  ;;  %3489 = vmatpush3.bf16.msra.mxu0 %v3488_v43  ;;  %v2375_v43 = vld [vmem:[%s4626_s4 + $0x360] sm:$0xff] }
 0xa2e   : > { %3491 = vmatprep.subr.bf16.mxu0 %v3490_v44  ;;  %v2376_v44 = vld [vmem:[%s4626_s4 + $0x370] sm:$0xff] }
 0xa30   : > { %3425 = vmatpush1.bf16.msra.mxu1 %v3424_v52  ;;  %v2135_v52 = vld [vmem:[%s4626_s4 + $0x80] sm:$0xff] }
 0xa31   : > { %3427 = vmatprep.subr.bf16.mxu1 %v3426_v55  ;;  %v2142_v55 = vld [vmem:[%s4626_s4 + $0xb8] sm:$0xff]  ;;  %v3436_v57 = vpack.c.bf16 %v2137_v53, %v2135_v52  ;;  %3493 = vmatpush3.bf16.msra.mxu0 %v3492_v39 }
 0xa32   : > { %v3438_v59 = vpack.c.bf16 %v2142_v55, %v2140_v54  ;;  %3495 = vmatprep.subr.bf16.mxu0 %v3494_v42 }
 0xa34   : > { %3429 = vmatpush1.bf16.msra.mxu1 %v3428_v58 }
 0xa35   : > { %3431 = vmatprep.subr.bf16.mxu1 %v3430_v61  ;;  %v2141_v61 = vld [vmem:[%s4626_s4 + $0xb0] sm:$0xff] }
 0xa38   : > { %3433 = vmatpush1.bf16.msra.mxu1 %v3432_v0  ;;  %v3440_v0 = vpack.c.bf16 %v2141_v61, %v2139_v60 }
 0xa39   : > { %3435 = vmatprep.subr.bf16.mxu1 %v3434_v4  ;;  %v2145_v4 = vld [vmem:[%s4626_s4 + $0xd0] sm:$0xff] }
 0xa3a   : > { %v3444_v7 = vpack.c.bf16 %v2145_v4, %v2143_v3  ;;  %v2470_v3 = vld [vmem:[%s4626_s4 + $0x4d0] sm:$0xff] }
 0xaea   : > { %v2128_v45 = vpop.f32.mrb[34].mxu0 }
 0xaeb   : > { %v3218_v46 = vpop.f32.mrb[35].mxu0 }
 0xaec   : > { %v2347_v46 = vlaneseq }
 0xaee   : > { %v2055_v47 = vpop.f32.mrb[28].mxu1 }
 0xaef   : > { %v2129_v49 = vadd.f32 %v2128_v45, %v2055_v47  ;;  %v3207_v50 = vpop.f32.mrb[29].mxu1  ;;  %v3496_v45 = vpack.c.bf16 %v2376_v44, %v2375_v43  ;;  %v2348_v47 = vshrl.u32 %v2347_v46, 7 }
 0xaf1   : > { %v4396_v51 = vadd.f32 %v2132_v48, %v2129_v49  ;;  %3497 = vmatpush3.bf16.msra.mxu0 %v3496_v45  ;;  %v2349_v48 = vsub.s32 0, %v2348_v47  ;;  %v2740_v49 = vld [vmem:[%s4627_s5 + $0x16] ss:$8 sm:$0x3]  ;;  %v2353_v50 = vsub.s32 1, %v2348_v47 }
 0xaf2   : > { %3498 = vmatprep.subr.bf16.mxu0 %v3642_v14 }
 0xaf3   : > { %v2134_v56 = vmax.f32 %v4396_v51, 0.0  ;;  %v2350_v51 = vrot.slane %v2740_v49, %v2349_v48  ;;  %v2354_v52 = vrot.slane %v2740_v49, %v2353_v50 }
 0xaf5   : > { %v2200_v58 = vrot.slane %v2134_v56, 1 }
 0xaf7   : > { %2267 = vmatmul.mubr.f32.vlgmr.msra.gmra.mrb[30].mxu1 %v2200_v58 }
 0xaf8   : > { %3437 = vmatpush1.bf16.msra.mxu1 %v3436_v57  ;;  %2337 = vmatprep.mubr.f32.mxu1 %v3640_v1  ;;  %v2466_v57 = vld [vmem:[%s4626_s4 + $0x490] sm:$0xff] }
 0xaf9   : > { %3439 = vmatprep.subr.bf16.mxu1 %v3438_v59 }
 0xafc   : > { %3441 = vmatpush1.bf16.msra.mxu1 %v3440_v0  ;;  %v3502_v0 = vpack.c.bf16 %v2468_v63, %v2467_v62 }
 0xafd   : > { %3443 = vmatprep.subr.bf16.mxu1 %v3442_v2  ;;  %v2469_v2 = vld [vmem:[%s4626_s4 + $0x4c0] sm:$0xff] }
 0xafe   : > { %v3505_v4 = vpack.c.bf16 %v2470_v3, %v2469_v2 }
 0xb00   : > { %3445 = vmatpush1.bf16.msra.mxu1 %v3444_v7  ;;  %v2473_v7 = vld [vmem:[%s4626_s4 + $0x500] sm:$0xff] }
 0xb01   : > { %3447 = vmatprep.subr.bf16.mxu1 %v3446_v8  ;;  %v2474_v8 = vld [vmem:[%s4626_s4 + $0x510] sm:$0xff] }
 0xb02   : > { %v3511_v9 = vpack.c.bf16 %v2474_v8, %v2473_v7 }
 0xb04   : > { %3449 = vmatpush1.bf16.msra.mxu1 %v3448_v13  ;;  %v2477_v13 = vld [vmem:[%s4626_s4 + $0x540] sm:$0xff] }
 0xb05   : > { %3451 = vmatprep.subr.bf16.mxu1 %v3450_v15  ;;  %v2478_v15 = vld [vmem:[%s4626_s4 + $0x550] sm:$0xff] }
 0xb06   : > { %v3517_v16 = vpack.c.bf16 %v2478_v15, %v2477_v13 }
 0xb08   : > { %3453 = vmatpush1.bf16.msra.mxu1 %v3452_v20 }
 0xb09   : > { %3455 = vmatprep.subr.bf16.mxu1 %v3454_v21  ;;  %v2393_v21 = vld [vmem:[%s4627_s5 + $0x17] ss:$0 sm:$0xff] }
 0xb0c   : > { %3457 = vmatpush1.bf16.msra.mxu1 %v3456_v26 }
 0xb0d   : > { %3459 = vmatprep.subr.bf16.mxu1 %v3458_v27 }
 0xb10   : > { %3461 = vmatpush1.bf16.msra.mxu1 %v3460_v32 }
 0xb11   : > { %3463 = vmatprep.subr.bf16.mxu1 %v3462_v33 }
 0xb14   : > { %3465 = vmatpush1.bf16.msra.mxu1 %v3464_v36 }
 0xb17   : > { %2338 = vmatmul.mubr.f32.vlgmr.msra.gmra.mrb[30].mxu1 %v2134_v56  ;;  %v2465_v56 = vld [vmem:[%s4626_s4 + $0x480] sm:$0xff] }
 0xb18   : > { %v3499_v60 = vpack.c.bf16 %v2466_v57, %v2465_v56 }
 0xbea   : > { %v2339_v53 = vpop.f32.mrb[30].mxu1 }
 0xbeb   : > { %v2357_v54 = vadd.f32 %v2350_v51, %v2339_v53  ;;  %v2341_v55 = vpop.f32.mrb[31].mxu1 }
 0xbec   : > { %v2358_v58 = vadd.f32 %v2354_v52, %v2341_v55 }
 0xbed   : > { %v2359_v61 = vmax.f32 %v2357_v54, 0.0 }
 0xbee   : > { %v2360_v59 = vmax.f32 %v2358_v58, 0.0 }
 0xbf0   : > { %2458 = vmatprep.mubr.f32.mxu0 %v2360_v59 }
 0xbf1   : > { %2459 = vmatmul.mubr.f32.vlgmr.msra.gmra.mrb[36].mxu0 %v2359_v61 }
 0xbf2   : > { %3500 = vmatpush3.bf16.msra.mxu0 %v3499_v60  ;;  %3251 = vmatprep.mubr.msk.f32.mxu0 %vm3641_vm0, %v3640_v1  ;;  %v2472_v1 = vld [vmem:[%s4626_s4 + $0x4f0] sm:$0xff] }
 0xbf3   : > { %3501 = vmatprep.subr.bf16.mxu0 %v3642_v14  ;;  %v3508_v6 = vpack.c.bf16 %v2472_v1, %v2471_v5 }
 0xbf6   : > { %3503 = vmatpush3.bf16.msra.mxu0 %v3502_v0 }
 0xbf7   : > { %3504 = vmatprep.subr.bf16.mxu0 %v3642_v14 }
 0xbfa   : > { %3506 = vmatpush3.bf16.msra.mxu0 %v3505_v4 }
 0xbfb   : > { %3507 = vmatprep.subr.bf16.mxu0 %v3642_v14 }
 0xbfe   : > { %3509 = vmatpush3.bf16.msra.mxu0 %v3508_v6 }
 0xbff   : > { %3510 = vmatprep.subr.bf16.mxu0 %v3642_v14 }
 0xc02   : > { %3512 = vmatpush3.bf16.msra.mxu0 %v3511_v9 }
 0xc03   : > { %3513 = vmatprep.subr.bf16.mxu0 %v3642_v14 }
 0xc06   : > { %3515 = vmatpush3.bf16.msra.mxu0 %v3514_v12 }
 0xc07   : > { %3516 = vmatprep.subr.bf16.mxu0 %v3642_v14 }
 0xc0a   : > { %3518 = vmatpush3.bf16.msra.mxu0 %v3517_v16 }
 0xc0b   : > { %3519 = vmatprep.subr.bf16.mxu0 %v3642_v14  ;;  %v2481_v14 = vld [vmem:[%s4627_s5 + $0x20] ss:$0 sm:$0xff] }
 0xc0e   : > { %3521 = vmatpush3.bf16.msra.mxu0 %v3520_v19 }
 0xcc4   : > { %v2910_v20 = vpop.f32.mrb[36].mxu0 }
 0xcc5   : > { %v2911_v22 = vpop.f32.mrb[37].mxu0 }
 0xcc6   : > { %v2912_v23 = vadd.f32 %v2911_v22, %v2910_v20 }
 0xcc8   : > { %v2461_v24 = vadd.f32 %v2912_v23, %v2393_v21 }
 0xcca   : > { %v2464_v25 = vmax.f32 %v2461_v24, 0.0 }
 0xccc   : > { %3252 = vmatmul.mubr.f32.vlgmr.msra.gmra.mrb[38].mxu0 %v2464_v25 }
 0xd9f   : > { %v2548_v26 = vpop.f32.mrb[38].mxu0 }
 0xda0   : > { %v2549_v27 = vadd.f32 %v2548_v26, %v2481_v14  ;;  %v3253_v28 = vpop.f32.mrb[39].mxu0 }
 0xda2   : > { %2553 = vst.msk [vmem:[%s243_s12] sm:$0x1] %vm2552_vm14, %v2549_v27 }
 0xda3   : > { %3589 = shalt.err (!%p3586_p3)
}
 0xda4   : > { %s3590_s26 = scalar_lea.hbm %s4580_s16, 16  ;;  %s3594_s9 = scalar_lea.hbm %s4628_s6, 32 }
 0xda5   : > { %p3591_p4 = scmp.ne.s32.totalorder %s4580_s16, %s3590_s26  ;;  %p3595_p9 = scmp.lt.u32.totalorder %s4580_s16, %s4628_s6 }
 0xda6   : > { %p3596_p10 = scmp.lt.u32.totalorder %s3594_s9, %s3590_s26  ;;  %p3598_p12 = scmp.lt.u32.totalorder %s3590_s26, %s4580_s16 }
 0xda7   : > { %p3592_p7 = pnand %p3591_p4, %p3718_p5 }
 0xda8   : > { %p3597_p11 = por %p3596_p10, %p3595_p9 }
 0xda9   : > { %p3593_p8 = pneg %p3592_p7 }
 0xdaa   : > { %p3599_p13 = por %p3598_p12, %p3597_p11 }
 0xdac   : > { %p3600_p0 = pnand %p3599_p13, %p3593_p8 }
 0xdae   : > { %3603 = shalt.err (!%p3600_p0)
}
 0xdaf   : > { %3533 = dma.vmem_to_hbm [thread:$0]  (%p3718_p5), %s4582_s15, 16, %s4580_s16, %s2555_s17  }
 0xdb0 PF: > { %p3539_p1 = scmp.ge.s32.totalorder %s3638_s24, 2  ;;  %s2579_s12 = sand.u32 1, %s3626_s21  }
 0xdb1   : > { %s2580_s13 = scalar_lea.sflag [#allocation5], %s2579_s12 }
 0xdb2   : > { %p3536_p2 = pnand %p3539_p1, %p3722_p6 }
 0xdb4   : > { %3621 = dma.done.wait (!%p3536_p2), %s2580_s13, 16  }
 0xdb5   : > { %3623 = vsyncadd (!%p3536_p2), %s2580_s13, 4294967280  ;;  %p16_p3 = scmp.ge.s32.totalorder %s3705_s27, 4   ;;  %s4631_s21 = smov %s3630_s22 }
 0xdb6   : > { %s4632_s22 = smov %s3634_s23  ;;  %s4633_s23 = smov %s3716_s30 }
 0xdb7   : > { %s4634_s24 = smov %s3705_s27  ;;  %18 = sbr.rel (!%p16_p3) target bundleno = 3 (0x3), region = 94 }
 0xdbe   :  { %2584 = vsyncpa [#allocation5], 1 }
 0xdbf   :  { %2586 = vsyncpa [#allocation5 + $0x1], 1 }

</bundles_post_ra>
